<compile_context>
chip_gen: v6e
topology: v6e:2x2x1
jax: 0.10.0
libtpu: 0.0.40
codegen_flags: <defaults>
</compile_context>

<pallas_src>
import numpy as np
import jax
import jax.numpy as jnp
from jax.experimental import pallas as pl
from jax.experimental.pallas import tpu as pltpu

# Model dims (from the reference script: AutoEncoderLayer(J,50), AutoEncoderLayer(50,32),
# bidirectional LSTM with num_layers=2, fc: Linear(2*hidden, output_size)).
J = 4                # raw input feature size (encoder_1 input size)
ENC1 = 50            # encoder_1 output size
ENC2 = 32            # encoder_2 output size == LSTM input size
HID = 32             # hidden_layer_size (kept small; PyTorch default is 100)
NUM_LSTM_LAYERS = 2  # num_layers = 2 in the reference script
OUT = 1              # output_size

H = HID
H2, H4, H8 = 2 * H, 4 * H, 8 * H

# ---- packed weight-slab layout (row offsets, all 8-aligned; lane width = 8H = 256) ----
ENC_W = 64                      # encoder block lane width (>= ENC1 + 1)
ENC1_ROWS = 8                   # >= J + 1
ENC2_ROWS = 64                  # >= ENC1 + 1
WIH0_ROWS = ENC_W               # must equal h2 width (rows beyond ENC2 are zero)
ENC1_R = 0                      # (ENC1_ROWS, ENC_W): enc1 weight rows 0..J-1, bias row J
ENC2_R = ENC1_R + ENC1_ROWS     # (ENC2_ROWS, ENC_W): enc2 weight rows 0..ENC1-1, 2*bias row ENC1
WIH0_R = ENC2_R + ENC2_ROWS     # (WIH0_ROWS, 8H): layer-0 input projection, 2*bias row ENC2
WHH0_R = WIH0_R + WIH0_ROWS     # (2H, 8H): layer-0 recurrent (block scatter)
WIH1_R = WHH0_R + H2            # (2H, 8H): layer-1 input projection
WHH1_R = WIH1_R + H2            # (2H, 8H): layer-1 recurrent
BIAS_R = WHH1_R + H2            # row 0: layer-1 bias; row 1 col 0: fc bias; row 2 cols 0:2H: fc weight
W_ROWS = BIAS_R + 8

assert ENC_W >= ENC1 + 1 and ENC2_ROWS >= ENC1 + 1 and WIH0_ROWS >= ENC2 + 1
assert (H & (H - 1)) == 0       # power of two (lane mask uses a bitwise and)

# Gate-column permutation: natural [i|f|g|o]-per-direction layout ([fwd 4H | rev 4H]) ->
# combined [i_f i_r | f_f f_r | g_f g_r | o_f o_r] (each group 2H wide) so the fused
# fwd+rev cell can slice each gate as one contiguous 2H-lane group.
_GATE_PERM = np.concatenate(
    [np.concatenate([np.arange(k * H, (k + 1) * H),
                     np.arange(H4 + k * H, H4 + (k + 1) * H)]) for k in range(4)])


# ------------------- parameters -------------------
def init_params(key):
    def u(k, shape, fan_in):
        bound = 1.0 / float(fan_in) ** 0.5
        return jax.random.uniform(k, shape, jnp.float32, -bound, bound)

    keys = iter(jax.random.split(key, 64))
    p = {}
    p['enc1_w'] = u(next(keys), (J, ENC1), J)
    p['enc1_b'] = u(next(keys), (ENC1,), J)
    p['enc2_w'] = u(next(keys), (ENC1, ENC2), ENC1)
    p['enc2_b'] = u(next(keys), (ENC2,), ENC1)
    for l in range(NUM_LSTM_LAYERS):
        d_in = ENC2 if l == 0 else 2 * HID
        for d in ('fwd', 'rev'):
            w_ih_t = u(next(keys), (d_in, 4 * HID), HID)   # already transposed: (D_in, 4H)
            w_hh_t = u(next(keys), (HID, 4 * HID), HID)    # (H, 4H)
            b_ih = u(next(keys), (4 * HID,), HID)
            b_hh = u(next(keys), (4 * HID,), HID)
            p[f'lstm{l}_{d}'] = (w_ih_t, w_hh_t, b_ih + b_hh)
    p['fc_w'] = u(next(keys), (2 * HID, OUT), 2 * HID)
    p['fc_b'] = u(next(keys), (OUT,), 2 * HID)
    return p


# ------------------- host-side weight packing (plain XLA ops under jit) -------------------
def _pack_weights(p):
    f32 = jnp.float32
    perm = _GATE_PERM
    w = jnp.zeros((W_ROWS, H8), f32)

    # encoder 1: rows 0..J-1 = weight, row J = bias (input carries a ones column);
    # cols ENC1..ENC_W-1 stay zero so h1[:, ENC1:] == sigmoid(0) == 0.5 exactly.
    w = w.at[ENC1_R:ENC1_R + J, 0:ENC1].set(p['enc1_w'])
    w = w.at[ENC1_R + J, 0:ENC1].set(p['enc1_b'])

    # encoder 2: row ENC1 = 2*bias (multiplied by the constant 0.5 column of h1);
    # rows ENC1+1.. and cols ENC2.. stay zero so h2[:, ENC2:] == 0.5 exactly.
    w = w.at[ENC2_R:ENC2_R + ENC1, 0:ENC2].set(p['enc2_w'])
    w = w.at[ENC2_R + ENC1, 0:ENC2].set(2.0 * p['enc2_b'])

    wih0f, whh0f, b0f = p['lstm0_fwd']
    wih0r, whh0r, b0r = p['lstm0_rev']
    wih1f, whh1f, b1f = p['lstm1_fwd']
    wih1r, whh1r, b1r = p['lstm1_rev']

    # layer-0 input projection [fwd | rev]; bias folded via h2's constant-0.5 column.
    wih0 = jnp.zeros((WIH0_ROWS, H8), f32)
    wih0 = wih0.at[0:ENC2, 0:H4].set(wih0f)
    wih0 = wih0.at[0:ENC2, H4:H8].set(wih0r)
    wih0 = wih0.at[ENC2, 0:H4].set(2.0 * b0f)
    wih0 = wih0.at[ENC2, H4:H8].set(2.0 * b0r)
    w = w.at[WIH0_R:WIH0_R + WIH0_ROWS, :].set(wih0[:, perm])

    # layer-0 recurrent block scatter: rows [0:H) feed fwd gate cols, [H:2H) feed rev cols.
    whh0 = jnp.zeros((H2, H8), f32)
    whh0 = whh0.at[0:H, 0:H4].set(whh0f)
    whh0 = whh0.at[H:H2, H4:H8].set(whh0r)
    w = w.at[WHH0_R:WHH0_R + H2, :].set(whh0[:, perm])

    # layer-1 input projection (input is the [fwd0 | rev0] VMEM scratch: rows 0:H fwd, H:2H rev).
    wih1 = jnp.concatenate([wih1f, wih1r], axis=1)           # (2H, 8H)
    w = w.at[WIH1_R:WIH1_R + H2, :].set(wih1[:, perm])

    whh1 = jnp.zeros((H2, H8), f32)
    whh1 = whh1.at[0:H, 0:H4].set(whh1f)
    whh1 = whh1.at[H:H2, H4:H8].set(whh1r)
    w = w.at[WHH1_R:WHH1_R + H2, :].set(whh1[:, perm])

    # layer-1 bias row, fc bias scalar, fc weight row.
    b1 = jnp.concatenate([b1f, b1r])
    w = w.at[BIAS_R, :].set(b1[perm])
    w = w.at[BIAS_R + 1, 0].set(p['fc_b'][0])
    w = w.at[BIAS_R + 2, 0:H2].set(p['fc_w'][:, 0])
    return w


# ------------------- fused forward (single pallas_call, 2 operands) -------------------
@jax.jit
def sael_forward(x, p):
    S, B, j = x.shape
    SB = S * B

    w = _pack_weights(p)
    # ones-augmented input: cols [0:J) = x, col J = 1.0 (folds enc1 bias), rest 0.
    x_aug = jnp.zeros((SB, ENC1_ROWS), jnp.float32)
    x_aug = x_aug.at[:, 0:j].set(x.reshape(SB, j))
    x_aug = x_aug.at[:, j].set(1.0)

    def kernel(x_ref, w_ref, o_ref, proj, out0, out1):
        f32 = jnp.float32
        # Constant lane mask: fwd columns of the combined gate layout (first H of each 2H group).
        col = jax.lax.broadcasted_iota(jnp.int32, (B, H8), 1)
        fwd_cols = jnp.bitwise_and(col, H2 - 1) < H

        def bilstm(whh, out_ref):
            hc = jnp.zeros((B, H2), f32)          # [h_fwd | h_rev]
            cc = jnp.zeros((B, H2), f32)          # [c_fwd | c_rev]
            # Fully unrolled (S == 8).  TODO(synk): use lax.fori_loop(unroll=4..8) over the
            # VMEM proj scratch if S grows beyond ~16 to bound vreg pressure / compile time.
            for t in range(S):
                tr = S - 1 - t
                # x-projection: fwd gate columns from time t, rev columns from time S-1-t.
                px = jnp.where(fwd_cols,
                               proj[pl.ds(t * B, B), :],
                               proj[pl.ds(tr * B, B), :])
                # Single fused fwd+rev recurrent matmul: (B, 2H) @ (2H, 8H).
                gates = px + jnp.dot(hc, whh, preferred_element_type=f32)
                sg = jax.nn.sigmoid(gates)
                i_g = sg[:, 0:H2]
                f_g = sg[:, H2:2 * H2]
                g_g = jnp.tanh(gates[:, 2 * H2:3 * H2])
                o_g = sg[:, 3 * H2:4 * H2]
                cc = f_g * cc + i_g * g_g
                hc = o_g * jnp.tanh(cc)
                out_ref[pl.ds(t * B, B), pl.ds(0, H)] = hc[:, 0:H]     # fwd(t)
                out_ref[pl.ds(tr * B, B), pl.ds(H, H)] = hc[:, H:H2]   # rev(S-1-t)

        # ---- stacked sigmoid encoders (biases folded; extra cols are exact 0.5 constants) ----
        h1 = jax.nn.sigmoid(jnp.dot(x_ref[...], w_ref[ENC1_R:ENC1_R + ENC1_ROWS, 0:ENC_W],
                                    preferred_element_type=f32))
        h2 = jax.nn.sigmoid(jnp.dot(h1, w_ref[ENC2_R:ENC2_R + ENC2_ROWS, 0:ENC_W],
                                    preferred_element_type=f32))

        # ---- LSTM layer 0: hoisted input projection (bias folded) -> VMEM scratch ----
        proj[...] = jnp.dot(h2, w_ref[WIH0_R:WIH0_R + WIH0_ROWS, :], preferred_element_type=f32)
        bilstm(w_ref[WHH0_R:WHH0_R + H2, :], out0)

        # ---- LSTM layer 1: input is the [fwd0 | rev0] scratch; one matmul + bias row ----
        proj[...] = (jnp.dot(out0[...], w_ref[WIH1_R:WIH1_R + H2, :], preferred_element_type=f32)
                     + w_ref[BIAS_R:BIAS_R + 1, :])
        bilstm(w_ref[WHH1_R:WHH1_R + H2, :], out1)

        # ---- final fc: (SB, 2H) x fc-weight row, lane reduction, + bias ----
        fcw_row = w_ref[BIAS_R + 2:BIAS_R + 3, 0:H2]           # (1, 2H)
        pred = (jnp.sum(out1[...] * fcw_row, axis=1, keepdims=True)
                + w_ref[BIAS_R + 1:BIAS_R + 2, 0:1])
        o_ref[...] = pred.astype(o_ref.dtype)

    vmem = pl.BlockSpec(memory_space=pltpu.MemorySpace.VMEM)
    out = pl.pallas_call(
        kernel,
        out_shape=jax.ShapeDtypeStruct((SB, OUT), jnp.float32),
        in_specs=[vmem, vmem],
        out_specs=vmem,
        scratch_shapes=[pltpu.VMEM((SB, H8), jnp.float32),   # x-projection (reused by both layers)
                        pltpu.VMEM((SB, H2), jnp.float32),   # layer-0 [fwd|rev] hidden sequence
                        pltpu.VMEM((SB, H2), jnp.float32)],  # layer-1 [fwd|rev] hidden sequence
    )(x_aug, w)
    return out.reshape(S, B, OUT)


# ------------------- pure-JAX reference for correctness check -------------------
def _ref_lstm_dir(x, wih_t, whh_t, b, reverse):
    S, B, _ = x.shape
    Hh = whh_t.shape[0]
    h = jnp.zeros((B, Hh), jnp.float32)
    c = jnp.zeros((B, Hh), jnp.float32)
    order = range(S - 1, -1, -1) if reverse else range(S)
    outs = [None] * S
    for t in order:
        gates = x[t] @ wih_t + h @ whh_t + b
        i_g, f_g, g_g, o_g = jnp.split(gates, 4, axis=-1)
        i_g = jax.nn.sigmoid(i_g)
        f_g = jax.nn.sigmoid(f_g)
        g_g = jnp.tanh(g_g)
        o_g = jax.nn.sigmoid(o_g)
        c = f_g * c + i_g * g_g
        h = o_g * jnp.tanh(c)
        outs[t] = h
    return jnp.stack(outs, axis=0)


def sael_reference(x, p):
    S, B, j = x.shape
    h1 = jax.nn.sigmoid(x.reshape(S * B, j) @ p['enc1_w'] + p['enc1_b'])
    h2 = jax.nn.sigmoid(h1 @ p['enc2_w'] + p['enc2_b']).reshape(S, B, ENC2)
    layer_in = h2
    for l in range(NUM_LSTM_LAYERS):
        fwd = _ref_lstm_dir(layer_in, *p[f'lstm{l}_fwd'], reverse=False)
        rev = _ref_lstm_dir(layer_in, *p[f'lstm{l}_rev'], reverse=True)
        layer_in = jnp.concatenate([fwd, rev], axis=-1)
    pred = layer_in.reshape(S * B, 2 * HID) @ p['fc_w'] + p['fc_b']
    return pred.reshape(S, B, OUT)


if __name__ == "__main__":
    S, B = 8, 2
    key = jax.random.PRNGKey(0)
    k_x, k_p = jax.random.split(key)
    x = jax.random.normal(k_x, (S, B, J), jnp.float32)
    params = init_params(k_p)

    out = sael_forward(x, params)
    out = jax.block_until_ready(out)

    ref = sael_reference(x, params)
    assert out.shape == (S, B, OUT)
    assert jnp.allclose(out, ref, atol=1e-4, rtol=1e-4)
    print("KERNEL_OK")
</pallas_src>

<mosaic_0001>
module attributes {stable_mosaic.version = 11 : i64} {
  func.func @kernel(%arg0: memref<16x8xf32, #tpu.memory_space<vmem>>, %arg1: memref<336x256xf32, #tpu.memory_space<vmem>>, %arg2: memref<16x1xf32, #tpu.memory_space<vmem>>, %arg3: memref<16x256xf32, #tpu.memory_space<vmem>>, %arg4: memref<16x64xf32, #tpu.memory_space<vmem>>, %arg5: memref<16x64xf32, #tpu.memory_space<vmem>>) attributes {dimension_semantics = [], scalar_prefetch = 0 : i64, scratch_operands = 3 : i64, tpu.core_type = #tpu.core_type<tc>} {
    %0 = tpu.iota {dimensions = array<i32: 1>} : vector<2x256xi32>
    %c63_i32 = arith.constant 63 : i32
    %1 = vector.broadcast %c63_i32 : i32 to vector<2x256xi32>
    %2 = arith.andi %0, %1 : vector<2x256xi32>
    %c32_i32 = arith.constant 32 : i32
    %3 = vector.broadcast %c32_i32 : i32 to vector<2x256xi32>
    %4 = arith.cmpi slt, %2, %3 : vector<2x256xi32>
    %c0 = arith.constant 0 : index
    %c0_0 = arith.constant 0 : index
    %5 = vector.load %arg0[%c0, %c0_0] : memref<16x8xf32, #tpu.memory_space<vmem>>, vector<16x8xf32>
    %c0_1 = arith.constant 0 : index
    %c0_2 = arith.constant 0 : index
    %6 = vector.load %arg1[%c0_1, %c0_2] : memref<336x256xf32, #tpu.memory_space<vmem>>, vector<8x64xf32>
    %cst = arith.constant dense<0.000000e+00> : vector<16x64xf32>
    %7 = tpu.matmul %5, %6, %cst {dimension_numbers = #tpu.dot_dimension_numbers<[1], [0], [0], [1], [0, 0, 1, 1], [], []>} : vector<16x8xf32>, vector<8x64xf32>, vector<16x64xf32> -> vector<16x64xf32>
    %8 = arith.negf %7 : vector<16x64xf32>
    %9 = math.exp %8 : vector<16x64xf32>
    %cst_3 = arith.constant 1.000000e+00 : f32
    %10 = vector.broadcast %cst_3 : f32 to vector<16x64xf32>
    %11 = arith.addf %10, %9 : vector<16x64xf32>
    %12 = arith.divf %10, %11 : vector<16x64xf32>
    %c8 = arith.constant 8 : index
    %c0_4 = arith.constant 0 : index
    %13 = vector.load %arg1[%c8, %c0_4] : memref<336x256xf32, #tpu.memory_space<vmem>>, vector<64x64xf32>
    %cst_5 = arith.constant dense<0.000000e+00> : vector<16x64xf32>
    %14 = tpu.matmul %12, %13, %cst_5 {dimension_numbers = #tpu.dot_dimension_numbers<[1], [0], [0], [1], [0, 0, 1, 1], [], []>} : vector<16x64xf32>, vector<64x64xf32>, vector<16x64xf32> -> vector<16x64xf32>
    %15 = arith.negf %14 : vector<16x64xf32>
    %16 = math.exp %15 : vector<16x64xf32>
    %cst_6 = arith.constant 1.000000e+00 : f32
    %17 = vector.broadcast %cst_6 : f32 to vector<16x64xf32>
    %18 = arith.addf %17, %16 : vector<16x64xf32>
    %19 = arith.divf %17, %18 : vector<16x64xf32>
    %c72 = arith.constant 72 : index
    %c0_7 = arith.constant 0 : index
    %20 = vector.load %arg1[%c72, %c0_7] : memref<336x256xf32, #tpu.memory_space<vmem>>, vector<64x256xf32>
    %cst_8 = arith.constant dense<0.000000e+00> : vector<16x256xf32>
    %21 = tpu.matmul %19, %20, %cst_8 {dimension_numbers = #tpu.dot_dimension_numbers<[1], [0], [0], [1], [0, 0, 1, 1], [], []>} : vector<16x64xf32>, vector<64x256xf32>, vector<16x256xf32> -> vector<16x256xf32>
    %c0_9 = arith.constant 0 : index
    %c0_10 = arith.constant 0 : index
    %22 = vector.load %arg3[%c0_9, %c0_10] : memref<16x256xf32, #tpu.memory_space<vmem>>, vector<16x256xf32>
    tpu.vector_store %arg3[%c0_9, %c0_10], %21 {strides = array<i32>} : memref<16x256xf32, #tpu.memory_space<vmem>>, vector<16x256xf32>,
    %c136 = arith.constant 136 : index
    %c0_11 = arith.constant 0 : index
    %23 = vector.load %arg1[%c136, %c0_11] : memref<336x256xf32, #tpu.memory_space<vmem>>, vector<64x256xf32>
    %cst_12 = arith.constant 0.000000e+00 : f32
    %24 = vector.broadcast %cst_12 : f32 to vector<2x64xf32>
    %cst_13 = arith.constant 0.000000e+00 : f32
    %25 = vector.broadcast %cst_13 : f32 to vector<2x64xf32>
    %c0_14 = arith.constant 0 : index
    %c0_15 = arith.constant 0 : index
    %26 = vector.load %arg3[%c0_14, %c0_15] : memref<16x256xf32, #tpu.memory_space<vmem>>, vector<2x256xf32>
    %c14 = arith.constant 14 : index
    %c0_16 = arith.constant 0 : index
    %27 = vector.load %arg3[%c14, %c0_16] : memref<16x256xf32, #tpu.memory_space<vmem>>, vector<2x256xf32>
    %28 = arith.select %4, %26, %27 : vector<2x256xi1>, vector<2x256xf32>
    %cst_17 = arith.constant dense<0.000000e+00> : vector<2x256xf32>
    %29 = tpu.matmul %24, %23, %cst_17 {dimension_numbers = #tpu.dot_dimension_numbers<[1], [0], [0], [1], [0, 0, 1, 1], [], []>} : vector<2x64xf32>, vector<64x256xf32>, vector<2x256xf32> -> vector<2x256xf32>
    %30 = arith.addf %28, %29 : vector<2x256xf32>
    %31 = arith.negf %30 : vector<2x256xf32>
    %32 = math.exp %31 : vector<2x256xf32>
    %cst_18 = arith.constant 1.000000e+00 : f32
    %33 = vector.broadcast %cst_18 : f32 to vector<2x256xf32>
    %34 = arith.addf %33, %32 : vector<2x256xf32>
    %35 = arith.divf %33, %34 : vector<2x256xf32>
    %36 = vector.extract_strided_slice %35 {offsets = [0, 0], sizes = [2, 64], strides = [1, 1]} : vector<2x256xf32> to vector<2x64xf32>
    %37 = vector.extract_strided_slice %35 {offsets = [0, 64], sizes = [2, 64], strides = [1, 1]} : vector<2x256xf32> to vector<2x64xf32>
    %38 = vector.extract_strided_slice %30 {offsets = [0, 128], sizes = [2, 64], strides = [1, 1]} : vector<2x256xf32> to vector<2x64xf32>
    %39 = math.tanh %38 : vector<2x64xf32>
    %40 = vector.extract_strided_slice %35 {offsets = [0, 192], sizes = [2, 64], strides = [1, 1]} : vector<2x256xf32> to vector<2x64xf32>
    %41 = arith.mulf %37, %25 : vector<2x64xf32>
    %42 = arith.mulf %36, %39 : vector<2x64xf32>
    %43 = arith.addf %41, %42 : vector<2x64xf32>
    %44 = math.tanh %43 : vector<2x64xf32>
    %45 = arith.mulf %40, %44 : vector<2x64xf32>
    %46 = vector.extract_strided_slice %45 {offsets = [0, 0], sizes = [2, 32], strides = [1, 1]} : vector<2x64xf32> to vector<2x32xf32>
    %c0_19 = arith.constant 0 : index
    %c0_20 = arith.constant 0 : index
    %47 = vector.load %arg4[%c0_19, %c0_20] : memref<16x64xf32, #tpu.memory_space<vmem>>, vector<2x32xf32>
    tpu.vector_store %arg4[%c0_19, %c0_20], %46 {strides = array<i32>} : memref<16x64xf32, #tpu.memory_space<vmem>>, vector<2x32xf32>,
    %48 = vector.extract_strided_slice %45 {offsets = [0, 32], sizes = [2, 32], strides = [1, 1]} : vector<2x64xf32> to vector<2x32xf32>
    %c14_21 = arith.constant 14 : index
    %c32 = arith.constant 32 : index
    %49 = vector.load %arg4[%c14_21, %c32] : memref<16x64xf32, #tpu.memory_space<vmem>>, vector<2x32xf32>
    tpu.vector_store %arg4[%c14_21, %c32], %48 {strides = array<i32>} : memref<16x64xf32, #tpu.memory_space<vmem>>, vector<2x32xf32>,
    %c2 = arith.constant 2 : index
    %c0_22 = arith.constant 0 : index
    %50 = vector.load %arg3[%c2, %c0_22] : memref<16x256xf32, #tpu.memory_space<vmem>>, vector<2x256xf32>
    %c12 = arith.constant 12 : index
    %c0_23 = arith.constant 0 : index
    %51 = vector.load %arg3[%c12, %c0_23] : memref<16x256xf32, #tpu.memory_space<vmem>>, vector<2x256xf32>
    %52 = arith.select %4, %50, %51 : vector<2x256xi1>, vector<2x256xf32>
    %cst_24 = arith.constant dense<0.000000e+00> : vector<2x256xf32>
    %53 = tpu.matmul %45, %23, %cst_24 {dimension_numbers = #tpu.dot_dimension_numbers<[1], [0], [0], [1], [0, 0, 1, 1], [], []>} : vector<2x64xf32>, vector<64x256xf32>, vector<2x256xf32> -> vector<2x256xf32>
    %54 = arith.addf %52, %53 : vector<2x256xf32>
    %55 = arith.negf %54 : vector<2x256xf32>
    %56 = math.exp %55 : vector<2x256xf32>
    %cst_25 = arith.constant 1.000000e+00 : f32
    %57 = vector.broadcast %cst_25 : f32 to vector<2x256xf32>
    %58 = arith.addf %57, %56 : vector<2x256xf32>
    %59 = arith.divf %57, %58 : vector<2x256xf32>
    %60 = vector.extract_strided_slice %59 {offsets = [0, 0], sizes = [2, 64], strides = [1, 1]} : vector<2x256xf32> to vector<2x64xf32>
    %61 = vector.extract_strided_slice %59 {offsets = [0, 64], sizes = [2, 64], strides = [1, 1]} : vector<2x256xf32> to vector<2x64xf32>
    %62 = vector.extract_strided_slice %54 {offsets = [0, 128], sizes = [2, 64], strides = [1, 1]} : vector<2x256xf32> to vector<2x64xf32>
    %63 = math.tanh %62 : vector<2x64xf32>
    %64 = vector.extract_strided_slice %59 {offsets = [0, 192], sizes = [2, 64], strides = [1, 1]} : vector<2x256xf32> to vector<2x64xf32>
    %65 = arith.mulf %61, %43 : vector<2x64xf32>
    %66 = arith.mulf %60, %63 : vector<2x64xf32>
    %67 = arith.addf %65, %66 : vector<2x64xf32>
    %68 = math.tanh %67 : vector<2x64xf32>
    %69 = arith.mulf %64, %68 : vector<2x64xf32>
    %70 = vector.extract_strided_slice %69 {offsets = [0, 0], sizes = [2, 32], strides = [1, 1]} : vector<2x64xf32> to vector<2x32xf32>
    %c2_26 = arith.constant 2 : index
    %c0_27 = arith.constant 0 : index
    %71 = vector.load %arg4[%c2_26, %c0_27] : memref<16x64xf32, #tpu.memory_space<vmem>>, vector<2x32xf32>
    tpu.vector_store %arg4[%c2_26, %c0_27], %70 {strides = array<i32>} : memref<16x64xf32, #tpu.memory_space<vmem>>, vector<2x32xf32>,
    %72 = vector.extract_strided_slice %69 {offsets = [0, 32], sizes = [2, 32], strides = [1, 1]} : vector<2x64xf32> to vector<2x32xf32>
    %c12_28 = arith.constant 12 : index
    %c32_29 = arith.constant 32 : index
    %73 = vector.load %arg4[%c12_28, %c32_29] : memref<16x64xf32, #tpu.memory_space<vmem>>, vector<2x32xf32>
    tpu.vector_store %arg4[%c12_28, %c32_29], %72 {strides = array<i32>} : memref<16x64xf32, #tpu.memory_space<vmem>>, vector<2x32xf32>,
    %c4 = arith.constant 4 : index
    %c0_30 = arith.constant 0 : index
    %74 = vector.load %arg3[%c4, %c0_30] : memref<16x256xf32, #tpu.memory_space<vmem>>, vector<2x256xf32>
    %c10 = arith.constant 10 : index
    %c0_31 = arith.constant 0 : index
    %75 = vector.load %arg3[%c10, %c0_31] : memref<16x256xf32, #tpu.memory_space<vmem>>, vector<2x256xf32>
    %76 = arith.select %4, %74, %75 : vector<2x256xi1>, vector<2x256xf32>
    %cst_32 = arith.constant dense<0.000000e+00> : vector<2x256xf32>
    %77 = tpu.matmul %69, %23, %cst_32 {dimension_numbers = #tpu.dot_dimension_numbers<[1], [0], [0], [1], [0, 0, 1, 1], [], []>} : vector<2x64xf32>, vector<64x256xf32>, vector<2x256xf32> -> vector<2x256xf32>
    %78 = arith.addf %76, %77 : vector<2x256xf32>
    %79 = arith.negf %78 : vector<2x256xf32>
    %80 = math.exp %79 : vector<2x256xf32>
    %cst_33 = arith.constant 1.000000e+00 : f32
    %81 = vector.broadcast %cst_33 : f32 to vector<2x256xf32>
    %82 = arith.addf %81, %80 : vector<2x256xf32>
    %83 = arith.divf %81, %82 : vector<2x256xf32>
    %84 = vector.extract_strided_slice %83 {offsets = [0, 0], sizes = [2, 64], strides = [1, 1]} : vector<2x256xf32> to vector<2x64xf32>
    %85 = vector.extract_strided_slice %83 {offsets = [0, 64], sizes = [2, 64], strides = [1, 1]} : vector<2x256xf32> to vector<2x64xf32>
    %86 = vector.extract_strided_slice %78 {offsets = [0, 128], sizes = [2, 64], strides = [1, 1]} : vector<2x256xf32> to vector<2x64xf32>
    %87 = math.tanh %86 : vector<2x64xf32>
    %88 = vector.extract_strided_slice %83 {offsets = [0, 192], sizes = [2, 64], strides = [1, 1]} : vector<2x256xf32> to vector<2x64xf32>
    %89 = arith.mulf %85, %67 : vector<2x64xf32>
    %90 = arith.mulf %84, %87 : vector<2x64xf32>
    %91 = arith.addf %89, %90 : vector<2x64xf32>
    %92 = math.tanh %91 : vector<2x64xf32>
    %93 = arith.mulf %88, %92 : vector<2x64xf32>
    %94 = vector.extract_strided_slice %93 {offsets = [0, 0], sizes = [2, 32], strides = [1, 1]} : vector<2x64xf32> to vector<2x32xf32>
    %c4_34 = arith.constant 4 : index
    %c0_35 = arith.constant 0 : index
    %95 = vector.load %arg4[%c4_34, %c0_35] : memref<16x64xf32, #tpu.memory_space<vmem>>, vector<2x32xf32>
    tpu.vector_store %arg4[%c4_34, %c0_35], %94 {strides = array<i32>} : memref<16x64xf32, #tpu.memory_space<vmem>>, vector<2x32xf32>,
    %96 = vector.extract_strided_slice %93 {offsets = [0, 32], sizes = [2, 32], strides = [1, 1]} : vector<2x64xf32> to vector<2x32xf32>
    %c10_36 = arith.constant 10 : index
    %c32_37 = arith.constant 32 : index
    %97 = vector.load %arg4[%c10_36, %c32_37] : memref<16x64xf32, #tpu.memory_space<vmem>>, vector<2x32xf32>
    tpu.vector_store %arg4[%c10_36, %c32_37], %96 {strides = array<i32>} : memref<16x64xf32, #tpu.memory_space<vmem>>, vector<2x32xf32>,
    %c6 = arith.constant 6 : index
    %c0_38 = arith.constant 0 : index
    %98 = vector.load %arg3[%c6, %c0_38] : memref<16x256xf32, #tpu.memory_space<vmem>>, vector<2x256xf32>
    %c8_39 = arith.constant 8 : index
    %c0_40 = arith.constant 0 : index
    %99 = vector.load %arg3[%c8_39, %c0_40] : memref<16x256xf32, #tpu.memory_space<vmem>>, vector<2x256xf32>
    %100 = arith.select %4, %98, %99 : vector<2x256xi1>, vector<2x256xf32>
    %cst_41 = arith.constant dense<0.000000e+00> : vector<2x256xf32>
    %101 = tpu.matmul %93, %23, %cst_41 {dimension_numbers = #tpu.dot_dimension_numbers<[1], [0], [0], [1], [0, 0, 1, 1], [], []>} : vector<2x64xf32>, vector<64x256xf32>, vector<2x256xf32> -> vector<2x256xf32>
    %102 = arith.addf %100, %101 : vector<2x256xf32>
    %103 = arith.negf %102 : vector<2x256xf32>
    %104 = math.exp %103 : vector<2x256xf32>
    %cst_42 = arith.constant 1.000000e+00 : f32
    %105 = vector.broadcast %cst_42 : f32 to vector<2x256xf32>
    %106 = arith.addf %105, %104 : vector<2x256xf32>
    %107 = arith.divf %105, %106 : vector<2x256xf32>
    %108 = vector.extract_strided_slice %107 {offsets = [0, 0], sizes = [2, 64], strides = [1, 1]} : vector<2x256xf32> to vector<2x64xf32>
    %109 = vector.extract_strided_slice %107 {offsets = [0, 64], sizes = [2, 64], strides = [1, 1]} : vector<2x256xf32> to vector<2x64xf32>
    %110 = vector.extract_strided_slice %102 {offsets = [0, 128], sizes = [2, 64], strides = [1, 1]} : vector<2x256xf32> to vector<2x64xf32>
    %111 = math.tanh %110 : vector<2x64xf32>
    %112 = vector.extract_strided_slice %107 {offsets = [0, 192], sizes = [2, 64], strides = [1, 1]} : vector<2x256xf32> to vector<2x64xf32>
    %113 = arith.mulf %109, %91 : vector<2x64xf32>
    %114 = arith.mulf %108, %111 : vector<2x64xf32>
    %115 = arith.addf %113, %114 : vector<2x64xf32>
    %116 = math.tanh %115 : vector<2x64xf32>
    %117 = arith.mulf %112, %116 : vector<2x64xf32>
    %118 = vector.extract_strided_slice %117 {offsets = [0, 0], sizes = [2, 32], strides = [1, 1]} : vector<2x64xf32> to vector<2x32xf32>
    %c6_43 = arith.constant 6 : index
    %c0_44 = arith.constant 0 : index
    %119 = vector.load %arg4[%c6_43, %c0_44] : memref<16x64xf32, #tpu.memory_space<vmem>>, vector<2x32xf32>
    tpu.vector_store %arg4[%c6_43, %c0_44], %118 {strides = array<i32>} : memref<16x64xf32, #tpu.memory_space<vmem>>, vector<2x32xf32>,
    %120 = vector.extract_strided_slice %117 {offsets = [0, 32], sizes = [2, 32], strides = [1, 1]} : vector<2x64xf32> to vector<2x32xf32>
    %c8_45 = arith.constant 8 : index
    %c32_46 = arith.constant 32 : index
    %121 = vector.load %arg4[%c8_45, %c32_46] : memref<16x64xf32, #tpu.memory_space<vmem>>, vector<2x32xf32>
    tpu.vector_store %arg4[%c8_45, %c32_46], %120 {strides = array<i32>} : memref<16x64xf32, #tpu.memory_space<vmem>>, vector<2x32xf32>,
    %c8_47 = arith.constant 8 : index
    %c0_48 = arith.constant 0 : index
    %122 = vector.load %arg3[%c8_47, %c0_48] : memref<16x256xf32, #tpu.memory_space<vmem>>, vector<2x256xf32>
    %c6_49 = arith.constant 6 : index
    %c0_50 = arith.constant 0 : index
    %123 = vector.load %arg3[%c6_49, %c0_50] : memref<16x256xf32, #tpu.memory_space<vmem>>, vector<2x256xf32>
    %124 = arith.select %4, %122, %123 : vector<2x256xi1>, vector<2x256xf32>
    %cst_51 = arith.constant dense<0.000000e+00> : vector<2x256xf32>
    %125 = tpu.matmul %117, %23, %cst_51 {dimension_numbers = #tpu.dot_dimension_numbers<[1], [0], [0], [1], [0, 0, 1, 1], [], []>} : vector<2x64xf32>, vector<64x256xf32>, vector<2x256xf32> -> vector<2x256xf32>
    %126 = arith.addf %124, %125 : vector<2x256xf32>
    %127 = arith.negf %126 : vector<2x256xf32>
    %128 = math.exp %127 : vector<2x256xf32>
    %cst_52 = arith.constant 1.000000e+00 : f32
    %129 = vector.broadcast %cst_52 : f32 to vector<2x256xf32>
    %130 = arith.addf %129, %128 : vector<2x256xf32>
    %131 = arith.divf %129, %130 : vector<2x256xf32>
    %132 = vector.extract_strided_slice %131 {offsets = [0, 0], sizes = [2, 64], strides = [1, 1]} : vector<2x256xf32> to vector<2x64xf32>
    %133 = vector.extract_strided_slice %131 {offsets = [0, 64], sizes = [2, 64], strides = [1, 1]} : vector<2x256xf32> to vector<2x64xf32>
    %134 = vector.extract_strided_slice %126 {offsets = [0, 128], sizes = [2, 64], strides = [1, 1]} : vector<2x256xf32> to vector<2x64xf32>
    %135 = math.tanh %134 : vector<2x64xf32>
    %136 = vector.extract_strided_slice %131 {offsets = [0, 192], sizes = [2, 64], strides = [1, 1]} : vector<2x256xf32> to vector<2x64xf32>
    %137 = arith.mulf %133, %115 : vector<2x64xf32>
    %138 = arith.mulf %132, %135 : vector<2x64xf32>
    %139 = arith.addf %137, %138 : vector<2x64xf32>
    %140 = math.tanh %139 : vector<2x64xf32>
    %141 = arith.mulf %136, %140 : vector<2x64xf32>
    %142 = vector.extract_strided_slice %141 {offsets = [0, 0], sizes = [2, 32], strides = [1, 1]} : vector<2x64xf32> to vector<2x32xf32>
    %c8_53 = arith.constant 8 : index
    %c0_54 = arith.constant 0 : index
    %143 = vector.load %arg4[%c8_53, %c0_54] : memref<16x64xf32, #tpu.memory_space<vmem>>, vector<2x32xf32>
    tpu.vector_store %arg4[%c8_53, %c0_54], %142 {strides = array<i32>} : memref<16x64xf32, #tpu.memory_space<vmem>>, vector<2x32xf32>,
    %144 = vector.extract_strided_slice %141 {offsets = [0, 32], sizes = [2, 32], strides = [1, 1]} : vector<2x64xf32> to vector<2x32xf32>
    %c6_55 = arith.constant 6 : index
    %c32_56 = arith.constant 32 : index
    %145 = vector.load %arg4[%c6_55, %c32_56] : memref<16x64xf32, #tpu.memory_space<vmem>>, vector<2x32xf32>
    tpu.vector_store %arg4[%c6_55, %c32_56], %144 {strides = array<i32>} : memref<16x64xf32, #tpu.memory_space<vmem>>, vector<2x32xf32>,
    %c10_57 = arith.constant 10 : index
    %c0_58 = arith.constant 0 : index
    %146 = vector.load %arg3[%c10_57, %c0_58] : memref<16x256xf32, #tpu.memory_space<vmem>>, vector<2x256xf32>
    %c4_59 = arith.constant 4 : index
    %c0_60 = arith.constant 0 : index
    %147 = vector.load %arg3[%c4_59, %c0_60] : memref<16x256xf32, #tpu.memory_space<vmem>>, vector<2x256xf32>
    %148 = arith.select %4, %146, %147 : vector<2x256xi1>, vector<2x256xf32>
    %cst_61 = arith.constant dense<0.000000e+00> : vector<2x256xf32>
    %149 = tpu.matmul %141, %23, %cst_61 {dimension_numbers = #tpu.dot_dimension_numbers<[1], [0], [0], [1], [0, 0, 1, 1], [], []>} : vector<2x64xf32>, vector<64x256xf32>, vector<2x256xf32> -> vector<2x256xf32>
    %150 = arith.addf %148, %149 : vector<2x256xf32>
    %151 = arith.negf %150 : vector<2x256xf32>
    %152 = math.exp %151 : vector<2x256xf32>
    %cst_62 = arith.constant 1.000000e+00 : f32
    %153 = vector.broadcast %cst_62 : f32 to vector<2x256xf32>
    %154 = arith.addf %153, %152 : vector<2x256xf32>
    %155 = arith.divf %153, %154 : vector<2x256xf32>
    %156 = vector.extract_strided_slice %155 {offsets = [0, 0], sizes = [2, 64], strides = [1, 1]} : vector<2x256xf32> to vector<2x64xf32>
    %157 = vector.extract_strided_slice %155 {offsets = [0, 64], sizes = [2, 64], strides = [1, 1]} : vector<2x256xf32> to vector<2x64xf32>
    %158 = vector.extract_strided_slice %150 {offsets = [0, 128], sizes = [2, 64], strides = [1, 1]} : vector<2x256xf32> to vector<2x64xf32>
    %159 = math.tanh %158 : vector<2x64xf32>
    %160 = vector.extract_strided_slice %155 {offsets = [0, 192], sizes = [2, 64], strides = [1, 1]} : vector<2x256xf32> to vector<2x64xf32>
    %161 = arith.mulf %157, %139 : vector<2x64xf32>
    %162 = arith.mulf %156, %159 : vector<2x64xf32>
    %163 = arith.addf %161, %162 : vector<2x64xf32>
    %164 = math.tanh %163 : vector<2x64xf32>
    %165 = arith.mulf %160, %164 : vector<2x64xf32>
    %166 = vector.extract_strided_slice %165 {offsets = [0, 0], sizes = [2, 32], strides = [1, 1]} : vector<2x64xf32> to vector<2x32xf32>
    %c10_63 = arith.constant 10 : index
    %c0_64 = arith.constant 0 : index
    %167 = vector.load %arg4[%c10_63, %c0_64] : memref<16x64xf32, #tpu.memory_space<vmem>>, vector<2x32xf32>
    tpu.vector_store %arg4[%c10_63, %c0_64], %166 {strides = array<i32>} : memref<16x64xf32, #tpu.memory_space<vmem>>, vector<2x32xf32>,
    %168 = vector.extract_strided_slice %165 {offsets = [0, 32], sizes = [2, 32], strides = [1, 1]} : vector<2x64xf32> to vector<2x32xf32>
    %c4_65 = arith.constant 4 : index
    %c32_66 = arith.constant 32 : index
    %169 = vector.load %arg4[%c4_65, %c32_66] : memref<16x64xf32, #tpu.memory_space<vmem>>, vector<2x32xf32>
    tpu.vector_store %arg4[%c4_65, %c32_66], %168 {strides = array<i32>} : memref<16x64xf32, #tpu.memory_space<vmem>>, vector<2x32xf32>,
    %c12_67 = arith.constant 12 : index
    %c0_68 = arith.constant 0 : index
    %170 = vector.load %arg3[%c12_67, %c0_68] : memref<16x256xf32, #tpu.memory_space<vmem>>, vector<2x256xf32>
    %c2_69 = arith.constant 2 : index
    %c0_70 = arith.constant 0 : index
    %171 = vector.load %arg3[%c2_69, %c0_70] : memref<16x256xf32, #tpu.memory_space<vmem>>, vector<2x256xf32>
    %172 = arith.select %4, %170, %171 : vector<2x256xi1>, vector<2x256xf32>
    %cst_71 = arith.constant dense<0.000000e+00> : vector<2x256xf32>
    %173 = tpu.matmul %165, %23, %cst_71 {dimension_numbers = #tpu.dot_dimension_numbers<[1], [0], [0], [1], [0, 0, 1, 1], [], []>} : vector<2x64xf32>, vector<64x256xf32>, vector<2x256xf32> -> vector<2x256xf32>
    %174 = arith.addf %172, %173 : vector<2x256xf32>
    %175 = arith.negf %174 : vector<2x256xf32>
    %176 = math.exp %175 : vector<2x256xf32>
    %cst_72 = arith.constant 1.000000e+00 : f32
    %177 = vector.broadcast %cst_72 : f32 to vector<2x256xf32>
    %178 = arith.addf %177, %176 : vector<2x256xf32>
    %179 = arith.divf %177, %178 : vector<2x256xf32>
    %180 = vector.extract_strided_slice %179 {offsets = [0, 0], sizes = [2, 64], strides = [1, 1]} : vector<2x256xf32> to vector<2x64xf32>
    %181 = vector.extract_strided_slice %179 {offsets = [0, 64], sizes = [2, 64], strides = [1, 1]} : vector<2x256xf32> to vector<2x64xf32>
    %182 = vector.extract_strided_slice %174 {offsets = [0, 128], sizes = [2, 64], strides = [1, 1]} : vector<2x256xf32> to vector<2x64xf32>
    %183 = math.tanh %182 : vector<2x64xf32>
    %184 = vector.extract_strided_slice %179 {offsets = [0, 192], sizes = [2, 64], strides = [1, 1]} : vector<2x256xf32> to vector<2x64xf32>
    %185 = arith.mulf %181, %163 : vector<2x64xf32>
    %186 = arith.mulf %180, %183 : vector<2x64xf32>
    %187 = arith.addf %185, %186 : vector<2x64xf32>
    %188 = math.tanh %187 : vector<2x64xf32>
    %189 = arith.mulf %184, %188 : vector<2x64xf32>
    %190 = vector.extract_strided_slice %189 {offsets = [0, 0], sizes = [2, 32], strides = [1, 1]} : vector<2x64xf32> to vector<2x32xf32>
    %c12_73 = arith.constant 12 : index
    %c0_74 = arith.constant 0 : index
    %191 = vector.load %arg4[%c12_73, %c0_74] : memref<16x64xf32, #tpu.memory_space<vmem>>, vector<2x32xf32>
    tpu.vector_store %arg4[%c12_73, %c0_74], %190 {strides = array<i32>} : memref<16x64xf32, #tpu.memory_space<vmem>>, vector<2x32xf32>,
    %192 = vector.extract_strided_slice %189 {offsets = [0, 32], sizes = [2, 32], strides = [1, 1]} : vector<2x64xf32> to vector<2x32xf32>
    %c2_75 = arith.constant 2 : index
    %c32_76 = arith.constant 32 : index
    %193 = vector.load %arg4[%c2_75, %c32_76] : memref<16x64xf32, #tpu.memory_space<vmem>>, vector<2x32xf32>
    tpu.vector_store %arg4[%c2_75, %c32_76], %192 {strides = array<i32>} : memref<16x64xf32, #tpu.memory_space<vmem>>, vector<2x32xf32>,
    %c14_77 = arith.constant 14 : index
    %c0_78 = arith.constant 0 : index
    %194 = vector.load %arg3[%c14_77, %c0_78] : memref<16x256xf32, #tpu.memory_space<vmem>>, vector<2x256xf32>
    %c0_79 = arith.constant 0 : index
    %c0_80 = arith.constant 0 : index
    %195 = vector.load %arg3[%c0_79, %c0_80] : memref<16x256xf32, #tpu.memory_space<vmem>>, vector<2x256xf32>
    %196 = arith.select %4, %194, %195 : vector<2x256xi1>, vector<2x256xf32>
    %cst_81 = arith.constant dense<0.000000e+00> : vector<2x256xf32>
    %197 = tpu.matmul %189, %23, %cst_81 {dimension_numbers = #tpu.dot_dimension_numbers<[1], [0], [0], [1], [0, 0, 1, 1], [], []>} : vector<2x64xf32>, vector<64x256xf32>, vector<2x256xf32> -> vector<2x256xf32>
    %198 = arith.addf %196, %197 : vector<2x256xf32>
    %199 = arith.negf %198 : vector<2x256xf32>
    %200 = math.exp %199 : vector<2x256xf32>
    %cst_82 = arith.constant 1.000000e+00 : f32
    %201 = vector.broadcast %cst_82 : f32 to vector<2x256xf32>
    %202 = arith.addf %201, %200 : vector<2x256xf32>
    %203 = arith.divf %201, %202 : vector<2x256xf32>
    %204 = vector.extract_strided_slice %203 {offsets = [0, 0], sizes = [2, 64], strides = [1, 1]} : vector<2x256xf32> to vector<2x64xf32>
    %205 = vector.extract_strided_slice %203 {offsets = [0, 64], sizes = [2, 64], strides = [1, 1]} : vector<2x256xf32> to vector<2x64xf32>
    %206 = vector.extract_strided_slice %198 {offsets = [0, 128], sizes = [2, 64], strides = [1, 1]} : vector<2x256xf32> to vector<2x64xf32>
    %207 = math.tanh %206 : vector<2x64xf32>
    %208 = vector.extract_strided_slice %203 {offsets = [0, 192], sizes = [2, 64], strides = [1, 1]} : vector<2x256xf32> to vector<2x64xf32>
    %209 = arith.mulf %205, %187 : vector<2x64xf32>
    %210 = arith.mulf %204, %207 : vector<2x64xf32>
    %211 = arith.addf %209, %210 : vector<2x64xf32>
    %212 = math.tanh %211 : vector<2x64xf32>
    %213 = arith.mulf %208, %212 : vector<2x64xf32>
    %214 = vector.extract_strided_slice %213 {offsets = [0, 0], sizes = [2, 32], strides = [1, 1]} : vector<2x64xf32> to vector<2x32xf32>
    %c14_83 = arith.constant 14 : index
    %c0_84 = arith.constant 0 : index
    %215 = vector.load %arg4[%c14_83, %c0_84] : memref<16x64xf32, #tpu.memory_space<vmem>>, vector<2x32xf32>
    tpu.vector_store %arg4[%c14_83, %c0_84], %214 {strides = array<i32>} : memref<16x64xf32, #tpu.memory_space<vmem>>, vector<2x32xf32>,
    %216 = vector.extract_strided_slice %213 {offsets = [0, 32], sizes = [2, 32], strides = [1, 1]} : vector<2x64xf32> to vector<2x32xf32>
    %c0_85 = arith.constant 0 : index
    %c32_86 = arith.constant 32 : index
    %217 = vector.load %arg4[%c0_85, %c32_86] : memref<16x64xf32, #tpu.memory_space<vmem>>, vector<2x32xf32>
    tpu.vector_store %arg4[%c0_85, %c32_86], %216 {strides = array<i32>} : memref<16x64xf32, #tpu.memory_space<vmem>>, vector<2x32xf32>,
    %c0_87 = arith.constant 0 : index
    %c0_88 = arith.constant 0 : index
    %218 = vector.load %arg4[%c0_87, %c0_88] : memref<16x64xf32, #tpu.memory_space<vmem>>, vector<16x64xf32>
    %c200 = arith.constant 200 : index
    %c0_89 = arith.constant 0 : index
    %219 = vector.load %arg1[%c200, %c0_89] : memref<336x256xf32, #tpu.memory_space<vmem>>, vector<64x256xf32>
    %cst_90 = arith.constant dense<0.000000e+00> : vector<16x256xf32>
    %220 = tpu.matmul %218, %219, %cst_90 {dimension_numbers = #tpu.dot_dimension_numbers<[1], [0], [0], [1], [0, 0, 1, 1], [], []>} : vector<16x64xf32>, vector<64x256xf32>, vector<16x256xf32> -> vector<16x256xf32>
    %c328 = arith.constant 328 : index
    %c0_91 = arith.constant 0 : index
    %221 = vector.load %arg1[%c328, %c0_91] : memref<336x256xf32, #tpu.memory_space<vmem>>, vector<1x256xf32>
    %222 = vector.broadcast %221 : vector<1x256xf32> to vector<16x256xf32>
    %223 = arith.addf %220, %222 : vector<16x256xf32>
    %c0_92 = arith.constant 0 : index
    %c0_93 = arith.constant 0 : index
    %224 = vector.load %arg3[%c0_92, %c0_93] : memref<16x256xf32, #tpu.memory_space<vmem>>, vector<16x256xf32>
    tpu.vector_store %arg3[%c0_92, %c0_93], %223 {strides = array<i32>} : memref<16x256xf32, #tpu.memory_space<vmem>>, vector<16x256xf32>,
    %c264 = arith.constant 264 : index
    %c0_94 = arith.constant 0 : index
    %225 = vector.load %arg1[%c264, %c0_94] : memref<336x256xf32, #tpu.memory_space<vmem>>, vector<64x256xf32>
    %cst_95 = arith.constant 0.000000e+00 : f32
    %226 = vector.broadcast %cst_95 : f32 to vector<2x64xf32>
    %cst_96 = arith.constant 0.000000e+00 : f32
    %227 = vector.broadcast %cst_96 : f32 to vector<2x64xf32>
    %c0_97 = arith.constant 0 : index
    %c0_98 = arith.constant 0 : index
    %228 = vector.load %arg3[%c0_97, %c0_98] : memref<16x256xf32, #tpu.memory_space<vmem>>, vector<2x256xf32>
    %c14_99 = arith.constant 14 : index
    %c0_100 = arith.constant 0 : index
    %229 = vector.load %arg3[%c14_99, %c0_100] : memref<16x256xf32, #tpu.memory_space<vmem>>, vector<2x256xf32>
    %230 = arith.select %4, %228, %229 : vector<2x256xi1>, vector<2x256xf32>
    %cst_101 = arith.constant dense<0.000000e+00> : vector<2x256xf32>
    %231 = tpu.matmul %226, %225, %cst_101 {dimension_numbers = #tpu.dot_dimension_numbers<[1], [0], [0], [1], [0, 0, 1, 1], [], []>} : vector<2x64xf32>, vector<64x256xf32>, vector<2x256xf32> -> vector<2x256xf32>
    %232 = arith.addf %230, %231 : vector<2x256xf32>
    %233 = arith.negf %232 : vector<2x256xf32>
    %234 = math.exp %233 : vector<2x256xf32>
    %cst_102 = arith.constant 1.000000e+00 : f32
    %235 = vector.broadcast %cst_102 : f32 to vector<2x256xf32>
    %236 = arith.addf %235, %234 : vector<2x256xf32>
    %237 = arith.divf %235, %236 : vector<2x256xf32>
    %238 = vector.extract_strided_slice %237 {offsets = [0, 0], sizes = [2, 64], strides = [1, 1]} : vector<2x256xf32> to vector<2x64xf32>
    %239 = vector.extract_strided_slice %237 {offsets = [0, 64], sizes = [2, 64], strides = [1, 1]} : vector<2x256xf32> to vector<2x64xf32>
    %240 = vector.extract_strided_slice %232 {offsets = [0, 128], sizes = [2, 64], strides = [1, 1]} : vector<2x256xf32> to vector<2x64xf32>
    %241 = math.tanh %240 : vector<2x64xf32>
    %242 = vector.extract_strided_slice %237 {offsets = [0, 192], sizes = [2, 64], strides = [1, 1]} : vector<2x256xf32> to vector<2x64xf32>
    %243 = arith.mulf %239, %227 : vector<2x64xf32>
    %244 = arith.mulf %238, %241 : vector<2x64xf32>
    %245 = arith.addf %243, %244 : vector<2x64xf32>
    %246 = math.tanh %245 : vector<2x64xf32>
    %247 = arith.mulf %242, %246 : vector<2x64xf32>
    %248 = vector.extract_strided_slice %247 {offsets = [0, 0], sizes = [2, 32], strides = [1, 1]} : vector<2x64xf32> to vector<2x32xf32>
    %c0_103 = arith.constant 0 : index
    %c0_104 = arith.constant 0 : index
    %249 = vector.load %arg5[%c0_103, %c0_104] : memref<16x64xf32, #tpu.memory_space<vmem>>, vector<2x32xf32>
    tpu.vector_store %arg5[%c0_103, %c0_104], %248 {strides = array<i32>} : memref<16x64xf32, #tpu.memory_space<vmem>>, vector<2x32xf32>,
    %250 = vector.extract_strided_slice %247 {offsets = [0, 32], sizes = [2, 32], strides = [1, 1]} : vector<2x64xf32> to vector<2x32xf32>
    %c14_105 = arith.constant 14 : index
    %c32_106 = arith.constant 32 : index
    %251 = vector.load %arg5[%c14_105, %c32_106] : memref<16x64xf32, #tpu.memory_space<vmem>>, vector<2x32xf32>
    tpu.vector_store %arg5[%c14_105, %c32_106], %250 {strides = array<i32>} : memref<16x64xf32, #tpu.memory_space<vmem>>, vector<2x32xf32>,
    %c2_107 = arith.constant 2 : index
    %c0_108 = arith.constant 0 : index
    %252 = vector.load %arg3[%c2_107, %c0_108] : memref<16x256xf32, #tpu.memory_space<vmem>>, vector<2x256xf32>
    %c12_109 = arith.constant 12 : index
    %c0_110 = arith.constant 0 : index
    %253 = vector.load %arg3[%c12_109, %c0_110] : memref<16x256xf32, #tpu.memory_space<vmem>>, vector<2x256xf32>
    %254 = arith.select %4, %252, %253 : vector<2x256xi1>, vector<2x256xf32>
    %cst_111 = arith.constant dense<0.000000e+00> : vector<2x256xf32>
    %255 = tpu.matmul %247, %225, %cst_111 {dimension_numbers = #tpu.dot_dimension_numbers<[1], [0], [0], [1], [0, 0, 1, 1], [], []>} : vector<2x64xf32>, vector<64x256xf32>, vector<2x256xf32> -> vector<2x256xf32>
    %256 = arith.addf %254, %255 : vector<2x256xf32>
    %257 = arith.negf %256 : vector<2x256xf32>
    %258 = math.exp %257 : vector<2x256xf32>
    %cst_112 = arith.constant 1.000000e+00 : f32
    %259 = vector.broadcast %cst_112 : f32 to vector<2x256xf32>
    %260 = arith.addf %259, %258 : vector<2x256xf32>
    %261 = arith.divf %259, %260 : vector<2x256xf32>
    %262 = vector.extract_strided_slice %261 {offsets = [0, 0], sizes = [2, 64], strides = [1, 1]} : vector<2x256xf32> to vector<2x64xf32>
    %263 = vector.extract_strided_slice %261 {offsets = [0, 64], sizes = [2, 64], strides = [1, 1]} : vector<2x256xf32> to vector<2x64xf32>
    %264 = vector.extract_strided_slice %256 {offsets = [0, 128], sizes = [2, 64], strides = [1, 1]} : vector<2x256xf32> to vector<2x64xf32>
    %265 = math.tanh %264 : vector<2x64xf32>
    %266 = vector.extract_strided_slice %261 {offsets = [0, 192], sizes = [2, 64], strides = [1, 1]} : vector<2x256xf32> to vector<2x64xf32>
    %267 = arith.mulf %263, %245 : vector<2x64xf32>
    %268 = arith.mulf %262, %265 : vector<2x64xf32>
    %269 = arith.addf %267, %268 : vector<2x64xf32>
    %270 = math.tanh %269 : vector<2x64xf32>
    %271 = arith.mulf %266, %270 : vector<2x64xf32>
    %272 = vector.extract_strided_slice %271 {offsets = [0, 0], sizes = [2, 32], strides = [1, 1]} : vector<2x64xf32> to vector<2x32xf32>
    %c2_113 = arith.constant 2 : index
    %c0_114 = arith.constant 0 : index
    %273 = vector.load %arg5[%c2_113, %c0_114] : memref<16x64xf32, #tpu.memory_space<vmem>>, vector<2x32xf32>
    tpu.vector_store %arg5[%c2_113, %c0_114], %272 {strides = array<i32>} : memref<16x64xf32, #tpu.memory_space<vmem>>, vector<2x32xf32>,
    %274 = vector.extract_strided_slice %271 {offsets = [0, 32], sizes = [2, 32], strides = [1, 1]} : vector<2x64xf32> to vector<2x32xf32>
    %c12_115 = arith.constant 12 : index
    %c32_116 = arith.constant 32 : index
    %275 = vector.load %arg5[%c12_115, %c32_116] : memref<16x64xf32, #tpu.memory_space<vmem>>, vector<2x32xf32>
    tpu.vector_store %arg5[%c12_115, %c32_116], %274 {strides = array<i32>} : memref<16x64xf32, #tpu.memory_space<vmem>>, vector<2x32xf32>,
    %c4_117 = arith.constant 4 : index
    %c0_118 = arith.constant 0 : index
    %276 = vector.load %arg3[%c4_117, %c0_118] : memref<16x256xf32, #tpu.memory_space<vmem>>, vector<2x256xf32>
    %c10_119 = arith.constant 10 : index
    %c0_120 = arith.constant 0 : index
    %277 = vector.load %arg3[%c10_119, %c0_120] : memref<16x256xf32, #tpu.memory_space<vmem>>, vector<2x256xf32>
    %278 = arith.select %4, %276, %277 : vector<2x256xi1>, vector<2x256xf32>
    %cst_121 = arith.constant dense<0.000000e+00> : vector<2x256xf32>
    %279 = tpu.matmul %271, %225, %cst_121 {dimension_numbers = #tpu.dot_dimension_numbers<[1], [0], [0], [1], [0, 0, 1, 1], [], []>} : vector<2x64xf32>, vector<64x256xf32>, vector<2x256xf32> -> vector<2x256xf32>
    %280 = arith.addf %278, %279 : vector<2x256xf32>
    %281 = arith.negf %280 : vector<2x256xf32>
    %282 = math.exp %281 : vector<2x256xf32>
    %cst_122 = arith.constant 1.000000e+00 : f32
    %283 = vector.broadcast %cst_122 : f32 to vector<2x256xf32>
    %284 = arith.addf %283, %282 : vector<2x256xf32>
    %285 = arith.divf %283, %284 : vector<2x256xf32>
    %286 = vector.extract_strided_slice %285 {offsets = [0, 0], sizes = [2, 64], strides = [1, 1]} : vector<2x256xf32> to vector<2x64xf32>
    %287 = vector.extract_strided_slice %285 {offsets = [0, 64], sizes = [2, 64], strides = [1, 1]} : vector<2x256xf32> to vector<2x64xf32>
    %288 = vector.extract_strided_slice %280 {offsets = [0, 128], sizes = [2, 64], strides = [1, 1]} : vector<2x256xf32> to vector<2x64xf32>
    %289 = math.tanh %288 : vector<2x64xf32>
    %290 = vector.extract_strided_slice %285 {offsets = [0, 192], sizes = [2, 64], strides = [1, 1]} : vector<2x256xf32> to vector<2x64xf32>
    %291 = arith.mulf %287, %269 : vector<2x64xf32>
    %292 = arith.mulf %286, %289 : vector<2x64xf32>
    %293 = arith.addf %291, %292 : vector<2x64xf32>
    %294 = math.tanh %293 : vector<2x64xf32>
    %295 = arith.mulf %290, %294 : vector<2x64xf32>
    %296 = vector.extract_strided_slice %295 {offsets = [0, 0], sizes = [2, 32], strides = [1, 1]} : vector<2x64xf32> to vector<2x32xf32>
    %c4_123 = arith.constant 4 : index
    %c0_124 = arith.constant 0 : index
    %297 = vector.load %arg5[%c4_123, %c0_124] : memref<16x64xf32, #tpu.memory_space<vmem>>, vector<2x32xf32>
    tpu.vector_store %arg5[%c4_123, %c0_124], %296 {strides = array<i32>} : memref<16x64xf32, #tpu.memory_space<vmem>>, vector<2x32xf32>,
    %298 = vector.extract_strided_slice %295 {offsets = [0, 32], sizes = [2, 32], strides = [1, 1]} : vector<2x64xf32> to vector<2x32xf32>
    %c10_125 = arith.constant 10 : index
    %c32_126 = arith.constant 32 : index
    %299 = vector.load %arg5[%c10_125, %c32_126] : memref<16x64xf32, #tpu.memory_space<vmem>>, vector<2x32xf32>
    tpu.vector_store %arg5[%c10_125, %c32_126], %298 {strides = array<i32>} : memref<16x64xf32, #tpu.memory_space<vmem>>, vector<2x32xf32>,
    %c6_127 = arith.constant 6 : index
    %c0_128 = arith.constant 0 : index
    %300 = vector.load %arg3[%c6_127, %c0_128] : memref<16x256xf32, #tpu.memory_space<vmem>>, vector<2x256xf32>
    %c8_129 = arith.constant 8 : index
    %c0_130 = arith.constant 0 : index
    %301 = vector.load %arg3[%c8_129, %c0_130] : memref<16x256xf32, #tpu.memory_space<vmem>>, vector<2x256xf32>
    %302 = arith.select %4, %300, %301 : vector<2x256xi1>, vector<2x256xf32>
    %cst_131 = arith.constant dense<0.000000e+00> : vector<2x256xf32>
    %303 = tpu.matmul %295, %225, %cst_131 {dimension_numbers = #tpu.dot_dimension_numbers<[1], [0], [0], [1], [0, 0, 1, 1], [], []>} : vector<2x64xf32>, vector<64x256xf32>, vector<2x256xf32> -> vector<2x256xf32>
    %304 = arith.addf %302, %303 : vector<2x256xf32>
    %305 = arith.negf %304 : vector<2x256xf32>
    %306 = math.exp %305 : vector<2x256xf32>
    %cst_132 = arith.constant 1.000000e+00 : f32
    %307 = vector.broadcast %cst_132 : f32 to vector<2x256xf32>
    %308 = arith.addf %307, %306 : vector<2x256xf32>
    %309 = arith.divf %307, %308 : vector<2x256xf32>
    %310 = vector.extract_strided_slice %309 {offsets = [0, 0], sizes = [2, 64], strides = [1, 1]} : vector<2x256xf32> to vector<2x64xf32>
    %311 = vector.extract_strided_slice %309 {offsets = [0, 64], sizes = [2, 64], strides = [1, 1]} : vector<2x256xf32> to vector<2x64xf32>
    %312 = vector.extract_strided_slice %304 {offsets = [0, 128], sizes = [2, 64], strides = [1, 1]} : vector<2x256xf32> to vector<2x64xf32>
    %313 = math.tanh %312 : vector<2x64xf32>
    %314 = vector.extract_strided_slice %309 {offsets = [0, 192], sizes = [2, 64], strides = [1, 1]} : vector<2x256xf32> to vector<2x64xf32>
    %315 = arith.mulf %311, %293 : vector<2x64xf32>
    %316 = arith.mulf %310, %313 : vector<2x64xf32>
    %317 = arith.addf %315, %316 : vector<2x64xf32>
    %318 = math.tanh %317 : vector<2x64xf32>
    %319 = arith.mulf %314, %318 : vector<2x64xf32>
    %320 = vector.extract_strided_slice %319 {offsets = [0, 0], sizes = [2, 32], strides = [1, 1]} : vector<2x64xf32> to vector<2x32xf32>
    %c6_133 = arith.constant 6 : index
    %c0_134 = arith.constant 0 : index
    %321 = vector.load %arg5[%c6_133, %c0_134] : memref<16x64xf32, #tpu.memory_space<vmem>>, vector<2x32xf32>
    tpu.vector_store %arg5[%c6_133, %c0_134], %320 {strides = array<i32>} : memref<16x64xf32, #tpu.memory_space<vmem>>, vector<2x32xf32>,
    %322 = vector.extract_strided_slice %319 {offsets = [0, 32], sizes = [2, 32], strides = [1, 1]} : vector<2x64xf32> to vector<2x32xf32>
    %c8_135 = arith.constant 8 : index
    %c32_136 = arith.constant 32 : index
    %323 = vector.load %arg5[%c8_135, %c32_136] : memref<16x64xf32, #tpu.memory_space<vmem>>, vector<2x32xf32>
    tpu.vector_store %arg5[%c8_135, %c32_136], %322 {strides = array<i32>} : memref<16x64xf32, #tpu.memory_space<vmem>>, vector<2x32xf32>,
    %c8_137 = arith.constant 8 : index
    %c0_138 = arith.constant 0 : index
    %324 = vector.load %arg3[%c8_137, %c0_138] : memref<16x256xf32, #tpu.memory_space<vmem>>, vector<2x256xf32>
    %c6_139 = arith.constant 6 : index
    %c0_140 = arith.constant 0 : index
    %325 = vector.load %arg3[%c6_139, %c0_140] : memref<16x256xf32, #tpu.memory_space<vmem>>, vector<2x256xf32>
    %326 = arith.select %4, %324, %325 : vector<2x256xi1>, vector<2x256xf32>
    %cst_141 = arith.constant dense<0.000000e+00> : vector<2x256xf32>
    %327 = tpu.matmul %319, %225, %cst_141 {dimension_numbers = #tpu.dot_dimension_numbers<[1], [0], [0], [1], [0, 0, 1, 1], [], []>} : vector<2x64xf32>, vector<64x256xf32>, vector<2x256xf32> -> vector<2x256xf32>
    %328 = arith.addf %326, %327 : vector<2x256xf32>
    %329 = arith.negf %328 : vector<2x256xf32>
    %330 = math.exp %329 : vector<2x256xf32>
    %cst_142 = arith.constant 1.000000e+00 : f32
    %331 = vector.broadcast %cst_142 : f32 to vector<2x256xf32>
    %332 = arith.addf %331, %330 : vector<2x256xf32>
    %333 = arith.divf %331, %332 : vector<2x256xf32>
    %334 = vector.extract_strided_slice %333 {offsets = [0, 0], sizes = [2, 64], strides = [1, 1]} : vector<2x256xf32> to vector<2x64xf32>
    %335 = vector.extract_strided_slice %333 {offsets = [0, 64], sizes = [2, 64], strides = [1, 1]} : vector<2x256xf32> to vector<2x64xf32>
    %336 = vector.extract_strided_slice %328 {offsets = [0, 128], sizes = [2, 64], strides = [1, 1]} : vector<2x256xf32> to vector<2x64xf32>
    %337 = math.tanh %336 : vector<2x64xf32>
    %338 = vector.extract_strided_slice %333 {offsets = [0, 192], sizes = [2, 64], strides = [1, 1]} : vector<2x256xf32> to vector<2x64xf32>
    %339 = arith.mulf %335, %317 : vector<2x64xf32>
    %340 = arith.mulf %334, %337 : vector<2x64xf32>
    %341 = arith.addf %339, %340 : vector<2x64xf32>
    %342 = math.tanh %341 : vector<2x64xf32>
    %343 = arith.mulf %338, %342 : vector<2x64xf32>
    %344 = vector.extract_strided_slice %343 {offsets = [0, 0], sizes = [2, 32], strides = [1, 1]} : vector<2x64xf32> to vector<2x32xf32>
    %c8_143 = arith.constant 8 : index
    %c0_144 = arith.constant 0 : index
    %345 = vector.load %arg5[%c8_143, %c0_144] : memref<16x64xf32, #tpu.memory_space<vmem>>, vector<2x32xf32>
    tpu.vector_store %arg5[%c8_143, %c0_144], %344 {strides = array<i32>} : memref<16x64xf32, #tpu.memory_space<vmem>>, vector<2x32xf32>,
    %346 = vector.extract_strided_slice %343 {offsets = [0, 32], sizes = [2, 32], strides = [1, 1]} : vector<2x64xf32> to vector<2x32xf32>
    %c6_145 = arith.constant 6 : index
    %c32_146 = arith.constant 32 : index
    %347 = vector.load %arg5[%c6_145, %c32_146] : memref<16x64xf32, #tpu.memory_space<vmem>>, vector<2x32xf32>
    tpu.vector_store %arg5[%c6_145, %c32_146], %346 {strides = array<i32>} : memref<16x64xf32, #tpu.memory_space<vmem>>, vector<2x32xf32>,
    %c10_147 = arith.constant 10 : index
    %c0_148 = arith.constant 0 : index
    %348 = vector.load %arg3[%c10_147, %c0_148] : memref<16x256xf32, #tpu.memory_space<vmem>>, vector<2x256xf32>
    %c4_149 = arith.constant 4 : index
    %c0_150 = arith.constant 0 : index
    %349 = vector.load %arg3[%c4_149, %c0_150] : memref<16x256xf32, #tpu.memory_space<vmem>>, vector<2x256xf32>
    %350 = arith.select %4, %348, %349 : vector<2x256xi1>, vector<2x256xf32>
    %cst_151 = arith.constant dense<0.000000e+00> : vector<2x256xf32>
    %351 = tpu.matmul %343, %225, %cst_151 {dimension_numbers = #tpu.dot_dimension_numbers<[1], [0], [0], [1], [0, 0, 1, 1], [], []>} : vector<2x64xf32>, vector<64x256xf32>, vector<2x256xf32> -> vector<2x256xf32>
    %352 = arith.addf %350, %351 : vector<2x256xf32>
    %353 = arith.negf %352 : vector<2x256xf32>
    %354 = math.exp %353 : vector<2x256xf32>
    %cst_152 = arith.constant 1.000000e+00 : f32
    %355 = vector.broadcast %cst_152 : f32 to vector<2x256xf32>
    %356 = arith.addf %355, %354 : vector<2x256xf32>
    %357 = arith.divf %355, %356 : vector<2x256xf32>
    %358 = vector.extract_strided_slice %357 {offsets = [0, 0], sizes = [2, 64], strides = [1, 1]} : vector<2x256xf32> to vector<2x64xf32>
    %359 = vector.extract_strided_slice %357 {offsets = [0, 64], sizes = [2, 64], strides = [1, 1]} : vector<2x256xf32> to vector<2x64xf32>
    %360 = vector.extract_strided_slice %352 {offsets = [0, 128], sizes = [2, 64], strides = [1, 1]} : vector<2x256xf32> to vector<2x64xf32>
    %361 = math.tanh %360 : vector<2x64xf32>
    %362 = vector.extract_strided_slice %357 {offsets = [0, 192], sizes = [2, 64], strides = [1, 1]} : vector<2x256xf32> to vector<2x64xf32>
    %363 = arith.mulf %359, %341 : vector<2x64xf32>
    %364 = arith.mulf %358, %361 : vector<2x64xf32>
    %365 = arith.addf %363, %364 : vector<2x64xf32>
    %366 = math.tanh %365 : vector<2x64xf32>
    %367 = arith.mulf %362, %366 : vector<2x64xf32>
    %368 = vector.extract_strided_slice %367 {offsets = [0, 0], sizes = [2, 32], strides = [1, 1]} : vector<2x64xf32> to vector<2x32xf32>
    %c10_153 = arith.constant 10 : index
    %c0_154 = arith.constant 0 : index
    %369 = vector.load %arg5[%c10_153, %c0_154] : memref<16x64xf32, #tpu.memory_space<vmem>>, vector<2x32xf32>
    tpu.vector_store %arg5[%c10_153, %c0_154], %368 {strides = array<i32>} : memref<16x64xf32, #tpu.memory_space<vmem>>, vector<2x32xf32>,
    %370 = vector.extract_strided_slice %367 {offsets = [0, 32], sizes = [2, 32], strides = [1, 1]} : vector<2x64xf32> to vector<2x32xf32>
    %c4_155 = arith.constant 4 : index
    %c32_156 = arith.constant 32 : index
    %371 = vector.load %arg5[%c4_155, %c32_156] : memref<16x64xf32, #tpu.memory_space<vmem>>, vector<2x32xf32>
    tpu.vector_store %arg5[%c4_155, %c32_156], %370 {strides = array<i32>} : memref<16x64xf32, #tpu.memory_space<vmem>>, vector<2x32xf32>,
    %c12_157 = arith.constant 12 : index
    %c0_158 = arith.constant 0 : index
    %372 = vector.load %arg3[%c12_157, %c0_158] : memref<16x256xf32, #tpu.memory_space<vmem>>, vector<2x256xf32>
    %c2_159 = arith.constant 2 : index
    %c0_160 = arith.constant 0 : index
    %373 = vector.load %arg3[%c2_159, %c0_160] : memref<16x256xf32, #tpu.memory_space<vmem>>, vector<2x256xf32>
    %374 = arith.select %4, %372, %373 : vector<2x256xi1>, vector<2x256xf32>
    %cst_161 = arith.constant dense<0.000000e+00> : vector<2x256xf32>
    %375 = tpu.matmul %367, %225, %cst_161 {dimension_numbers = #tpu.dot_dimension_numbers<[1], [0], [0], [1], [0, 0, 1, 1], [], []>} : vector<2x64xf32>, vector<64x256xf32>, vector<2x256xf32> -> vector<2x256xf32>
    %376 = arith.addf %374, %375 : vector<2x256xf32>
    %377 = arith.negf %376 : vector<2x256xf32>
    %378 = math.exp %377 : vector<2x256xf32>
    %cst_162 = arith.constant 1.000000e+00 : f32
    %379 = vector.broadcast %cst_162 : f32 to vector<2x256xf32>
    %380 = arith.addf %379, %378 : vector<2x256xf32>
    %381 = arith.divf %379, %380 : vector<2x256xf32>
    %382 = vector.extract_strided_slice %381 {offsets = [0, 0], sizes = [2, 64], strides = [1, 1]} : vector<2x256xf32> to vector<2x64xf32>
    %383 = vector.extract_strided_slice %381 {offsets = [0, 64], sizes = [2, 64], strides = [1, 1]} : vector<2x256xf32> to vector<2x64xf32>
    %384 = vector.extract_strided_slice %376 {offsets = [0, 128], sizes = [2, 64], strides = [1, 1]} : vector<2x256xf32> to vector<2x64xf32>
    %385 = math.tanh %384 : vector<2x64xf32>
    %386 = vector.extract_strided_slice %381 {offsets = [0, 192], sizes = [2, 64], strides = [1, 1]} : vector<2x256xf32> to vector<2x64xf32>
    %387 = arith.mulf %383, %365 : vector<2x64xf32>
    %388 = arith.mulf %382, %385 : vector<2x64xf32>
    %389 = arith.addf %387, %388 : vector<2x64xf32>
    %390 = math.tanh %389 : vector<2x64xf32>
    %391 = arith.mulf %386, %390 : vector<2x64xf32>
    %392 = vector.extract_strided_slice %391 {offsets = [0, 0], sizes = [2, 32], strides = [1, 1]} : vector<2x64xf32> to vector<2x32xf32>
    %c12_163 = arith.constant 12 : index
    %c0_164 = arith.constant 0 : index
    %393 = vector.load %arg5[%c12_163, %c0_164] : memref<16x64xf32, #tpu.memory_space<vmem>>, vector<2x32xf32>
    tpu.vector_store %arg5[%c12_163, %c0_164], %392 {strides = array<i32>} : memref<16x64xf32, #tpu.memory_space<vmem>>, vector<2x32xf32>,
    %394 = vector.extract_strided_slice %391 {offsets = [0, 32], sizes = [2, 32], strides = [1, 1]} : vector<2x64xf32> to vector<2x32xf32>
    %c2_165 = arith.constant 2 : index
    %c32_166 = arith.constant 32 : index
    %395 = vector.load %arg5[%c2_165, %c32_166] : memref<16x64xf32, #tpu.memory_space<vmem>>, vector<2x32xf32>
    tpu.vector_store %arg5[%c2_165, %c32_166], %394 {strides = array<i32>} : memref<16x64xf32, #tpu.memory_space<vmem>>, vector<2x32xf32>,
    %c14_167 = arith.constant 14 : index
    %c0_168 = arith.constant 0 : index
    %396 = vector.load %arg3[%c14_167, %c0_168] : memref<16x256xf32, #tpu.memory_space<vmem>>, vector<2x256xf32>
    %c0_169 = arith.constant 0 : index
    %c0_170 = arith.constant 0 : index
    %397 = vector.load %arg3[%c0_169, %c0_170] : memref<16x256xf32, #tpu.memory_space<vmem>>, vector<2x256xf32>
    %398 = arith.select %4, %396, %397 : vector<2x256xi1>, vector<2x256xf32>
    %cst_171 = arith.constant dense<0.000000e+00> : vector<2x256xf32>
    %399 = tpu.matmul %391, %225, %cst_171 {dimension_numbers = #tpu.dot_dimension_numbers<[1], [0], [0], [1], [0, 0, 1, 1], [], []>} : vector<2x64xf32>, vector<64x256xf32>, vector<2x256xf32> -> vector<2x256xf32>
    %400 = arith.addf %398, %399 : vector<2x256xf32>
    %401 = arith.negf %400 : vector<2x256xf32>
    %402 = math.exp %401 : vector<2x256xf32>
    %cst_172 = arith.constant 1.000000e+00 : f32
    %403 = vector.broadcast %cst_172 : f32 to vector<2x256xf32>
    %404 = arith.addf %403, %402 : vector<2x256xf32>
    %405 = arith.divf %403, %404 : vector<2x256xf32>
    %406 = vector.extract_strided_slice %405 {offsets = [0, 0], sizes = [2, 64], strides = [1, 1]} : vector<2x256xf32> to vector<2x64xf32>
    %407 = vector.extract_strided_slice %405 {offsets = [0, 64], sizes = [2, 64], strides = [1, 1]} : vector<2x256xf32> to vector<2x64xf32>
    %408 = vector.extract_strided_slice %400 {offsets = [0, 128], sizes = [2, 64], strides = [1, 1]} : vector<2x256xf32> to vector<2x64xf32>
    %409 = math.tanh %408 : vector<2x64xf32>
    %410 = vector.extract_strided_slice %405 {offsets = [0, 192], sizes = [2, 64], strides = [1, 1]} : vector<2x256xf32> to vector<2x64xf32>
    %411 = arith.mulf %407, %389 : vector<2x64xf32>
    %412 = arith.mulf %406, %409 : vector<2x64xf32>
    %413 = arith.addf %411, %412 : vector<2x64xf32>
    %414 = math.tanh %413 : vector<2x64xf32>
    %415 = arith.mulf %410, %414 : vector<2x64xf32>
    %416 = vector.extract_strided_slice %415 {offsets = [0, 0], sizes = [2, 32], strides = [1, 1]} : vector<2x64xf32> to vector<2x32xf32>
    %c14_173 = arith.constant 14 : index
    %c0_174 = arith.constant 0 : index
    %417 = vector.load %arg5[%c14_173, %c0_174] : memref<16x64xf32, #tpu.memory_space<vmem>>, vector<2x32xf32>
    tpu.vector_store %arg5[%c14_173, %c0_174], %416 {strides = array<i32>} : memref<16x64xf32, #tpu.memory_space<vmem>>, vector<2x32xf32>,
    %418 = vector.extract_strided_slice %415 {offsets = [0, 32], sizes = [2, 32], strides = [1, 1]} : vector<2x64xf32> to vector<2x32xf32>
    %c0_175 = arith.constant 0 : index
    %c32_176 = arith.constant 32 : index
    %419 = vector.load %arg5[%c0_175, %c32_176] : memref<16x64xf32, #tpu.memory_space<vmem>>, vector<2x32xf32>
    tpu.vector_store %arg5[%c0_175, %c32_176], %418 {strides = array<i32>} : memref<16x64xf32, #tpu.memory_space<vmem>>, vector<2x32xf32>,
    %c330 = arith.constant 330 : index
    %c0_177 = arith.constant 0 : index
    %420 = vector.load %arg1[%c330, %c0_177] : memref<336x256xf32, #tpu.memory_space<vmem>>, vector<1x64xf32>
    %c0_178 = arith.constant 0 : index
    %c0_179 = arith.constant 0 : index
    %421 = vector.load %arg5[%c0_178, %c0_179] : memref<16x64xf32, #tpu.memory_space<vmem>>, vector<16x64xf32>
    %422 = vector.broadcast %420 : vector<1x64xf32> to vector<16x64xf32>
    %423 = arith.mulf %421, %422 : vector<16x64xf32>
    %cst_180 = arith.constant dense<0.000000e+00> : vector<16xf32>
    %424 = vector.multi_reduction <add>, %423, %cst_180 [1] : vector<16x64xf32> to vector<16xf32>
    %425 = vector.shape_cast %424 : vector<16xf32> to vector<16x1xf32>
    %c329 = arith.constant 329 : index
    %c0_181 = arith.constant 0 : index
    %426 = vector.load %arg1[%c329, %c0_181] : memref<336x256xf32, #tpu.memory_space<vmem>>, vector<1x1xf32>
    %427 = vector.broadcast %426 : vector<1x1xf32> to vector<16x1xf32>
    %428 = arith.addf %425, %427 : vector<16x1xf32>
    %c0_182 = arith.constant 0 : index
    %c0_183 = arith.constant 0 : index
    %429 = vector.load %arg2[%c0_182, %c0_183] : memref<16x1xf32, #tpu.memory_space<vmem>>, vector<16x1xf32>
    tpu.vector_store %arg2[%c0_182, %c0_183], %428 {strides = array<i32>} : memref<16x1xf32, #tpu.memory_space<vmem>>, vector<16x1xf32>,
    return
  }
}

</mosaic_0001>

<bundles_post_ra>
// kernel: sael_forward.1
= control target key start
LH: loop header
LB: loop body
LE: loop exit
PB: predicated region body
PF: predicated region fallthrough
CT: control target
= control target key end

     0   :  { %vm21_vm0 = vcmask 64512   ;;  %vm123_vm1 = vcmask 523264   ;;  %v2788_v28 = vmov 0.0   ;;  %s2789_s8 = smov 64   ;;  %vm450_vm4 = vcmask 254976   ;;  %s3599_s1 = inlined_call_operand.vmem [shape: f32[336,256], index: 1, kind: input, shape index: {}]   ;;  %s3600_s0 = inlined_call_operand.vmem [shape: f32[16,8], index: 0, kind: input, shape index: {}]   ;;  %s3601_s2 = inlined_call_operand.vmem [shape: f32[16,1], index: 2, kind: output, shape index: {}]  }
   0x1   :  { %v20_v0 = vld [vmem:[%s3599_s1] sm:$0xff]  ;;  %v19_v2 = vld [vmem:[%s3600_s0 + $0x8] sm:$0xff]  ;;  %v121_v4 = vld [vmem:[%s3599_s1 + $0x70] sm:$0xff]  ;;  %vm452_vm5 = vcmask 517376   ;;  %vm576_vm6 = vcmask 257026   ;;  %vm578_vm7 = vcmask 519426  }
   0x2   :  { %v18_v1 = vld [vmem:[%s3600_s0] sm:$0xff]  ;;  %2554 = vmatprep.subr.mxu0 %v20_v0  ;;  %v119_v6 = vld [vmem:[%s3599_s1 + $0x50] sm:$0xff]  ;;  %v232_v21 = vld [vmem:[%s3599_s1 + $0x108] sm:$0xff]  ;;  %vm834_vm8 = vcmask 261126   ;;  %vm836_vm9 = vcmask 523526   ;;  %vm705_vm10 = vcmask 259076  }
   0x3   :  { %2556 = vmatprep.mubr.msk.f32.mxu0 %vm21_vm0, %v18_v1  ;;  %2555 = vmatpush3.msra.mxu0 %v20_v0  ;;  %v122_v3 = vld [vmem:[%s3599_s1 + $0x80] sm:$0xff]  ;;  %v117_v8 = vld [vmem:[%s3599_s1 + $0x30] sm:$0xff]  ;;  %v230_v23 = vld [vmem:[%s3599_s1 + $0xf8] sm:$0xff]  ;;  %vm707_vm11 = vcmask 521476   ;;  %vm2475_vm12 = vcmask 7168  }
   0x4   :  { %2557 = vmatmul.mubr.msk.f32.vlgmr.msra.gmra.mxu0 %vm21_vm0, %v19_v2  ;;  %2559 = vmatprep.subr.mxu1 %v122_v3  ;;  %v120_v5 = vld [vmem:[%s3599_s1 + $0x60] sm:$0xff]  ;;  %v115_v10 = vld [vmem:[%s3599_s1 + $0x10] sm:$0xff]  ;;  %v228_v25 = vld [vmem:[%s3599_s1 + $0xe8] sm:$0xff]  ;;  %v11_v2 = vlaneseq }
   0x5   :  { %2560 = vmatpush3.msra.mxu1 %v122_v3  ;;  %v118_v7 = vld [vmem:[%s3599_s1 + $0x40] sm:$0xff]  ;;  %255 = vmatprep.subr.mxu0 %v232_v21  ;;  %v229_v24 = vld [vmem:[%s3599_s1 + $0xf0] sm:$0xff]  ;;  %v226_v27 = vld [vmem:[%s3599_s1 + $0xd8] sm:$0xff] }
   0x6   :  { %2561 = vmatprep.subr.mxu1 %v121_v4  ;;  %v116_v9 = vld [vmem:[%s3599_s1 + $0x20] sm:$0xff]  ;;  %303 = vmatprep.mubr.f32.mxu0 %v2788_v28  ;;  %v225_v29 = vld [vmem:[%s3599_s1 + $0xd0] sm:$0xff]  ;;  %v224_v30 = vld [vmem:[%s3599_s1 + $0xc8] sm:$0xff] }
   0x7   :  { %2562 = vmatpush3.msra.mxu1 %v121_v4  ;;  %v231_v22 = vld [vmem:[%s3599_s1 + $0x100] sm:$0xff]  ;;  %v2872_v31 = vld [vmem:[%s3599_s1 + $0x188] sm:$0xff]  ;;  %v222_v34 = vld [vmem:[%s3599_s1 + $0xb8] sm:$0xff] }
   0x8   :  { %2563 = vmatprep.subr.mxu1 %v120_v5  ;;  %256 = vmatpush1.msra.mxu0 %v231_v22  ;;  %v227_v26 = vld [vmem:[%s3599_s1 + $0xe0] sm:$0xff]  ;;  %v2890_v35 = vld [vmem:[%s3599_s1 + $0x178] sm:$0xff]  ;;  %v221_v36 = vld [vmem:[%s3599_s1 + $0xb0] sm:$0xff] }
   0x9   :  { %2564 = vmatpush3.msra.mxu1 %v120_v5  ;;  %257 = vmatprep.subr.mxu0 %v230_v23  ;;  %v223_v32 = vld [vmem:[%s3599_s1 + $0xc0] sm:$0xff]  ;;  %v220_v37 = vld [vmem:[%s3599_s1 + $0xa8] sm:$0xff]  ;;  %v218_v39 = vld [vmem:[%s3599_s1 + $0x98] sm:$0xff]  ;;  %v12_v5 = vand.u32 127, %v11_v2 }
   0xa   :  { %2565 = vmatprep.subr.mxu1 %v119_v6  ;;  %258 = vmatpush1.msra.mxu0 %v229_v24  ;;  %v2881_v33 = vld [vmem:[%s3599_s1 + $0x180] sm:$0xff]  ;;  %v217_v40 = vld [vmem:[%s3599_s1 + $0x90] sm:$0xff]  ;;  %v2917_v42 = vld [vmem:[%s3599_s1 + $0x168] sm:$0xff] }
   0xb   :  { %2566 = vmatpush3.msra.mxu1 %v119_v6  ;;  %259 = vmatprep.subr.mxu0 %v228_v25  ;;  %v219_v38 = vld [vmem:[%s3599_s1 + $0xa0] sm:$0xff]  ;;  %v2911_v41 = vld [vmem:[%s3599_s1 + $0x170] sm:$0xff]  ;;  %v2929_v44 = vld [vmem:[%s3599_s1 + $0x158] sm:$0xff]  ;;  %v14_v6 = vand.u32 63, %v12_v5 }
   0xc   :  { %2567 = vmatprep.subr.mxu1 %v118_v7  ;;  %260 = vmatpush1.msra.mxu0 %v227_v26  ;;  %v2922_v43 = vld [vmem:[%s3599_s1 + $0x160] sm:$0xff]  ;;  %v2936_v45 = vld [vmem:[%s3599_s1 + $0x150] sm:$0xff]  ;;  %v2942_v46 = vld [vmem:[%s3599_s1 + $0x148] sm:$0xff] }
   0xd   :  { %2568 = vmatpush3.msra.mxu1 %v118_v7  ;;  %261 = vmatprep.subr.mxu0 %v226_v27  ;;  %v2947_v47 = vld [vmem:[%s3599_s1 + $0x140] sm:$0xff]  ;;  %v2952_v48 = vld [vmem:[%s3599_s1 + $0x138] sm:$0xff]  ;;  %v2958_v49 = vld [vmem:[%s3599_s1 + $0x130] sm:$0xff]  ;;  %vm3027_vm2 = vcmp.lt.s32.totalorder %v14_v6, 32 }
   0xe   :  { %2569 = vmatprep.subr.mxu1 %v117_v8  ;;  %262 = vmatpush1.msra.mxu0 %v225_v29  ;;  %v2964_v50 = vld [vmem:[%s3599_s1 + $0x128] sm:$0xff]  ;;  %v2970_v51 = vld [vmem:[%s3599_s1 + $0x120] sm:$0xff]  ;;  %v2976_v52 = vld [vmem:[%s3599_s1 + $0x118] sm:$0xff] }
   0xf   :  { %2570 = vmatpush3.msra.mxu1 %v117_v8  ;;  %263 = vmatprep.subr.mxu0 %v224_v30  ;;  %v2982_v53 = vld [vmem:[%s3599_s1 + $0x110] sm:$0xff] }
  0x10   :  { %2571 = vmatprep.subr.mxu1 %v116_v9  ;;  %264 = vmatpush1.msra.mxu0 %v223_v32 }
  0x11   :  { %2572 = vmatpush3.msra.mxu1 %v116_v9  ;;  %265 = vmatprep.subr.mxu0 %v222_v34 }
  0x12   :  { %2573 = vmatprep.subr.mxu1 %v115_v10  ;;  %266 = vmatpush1.msra.mxu0 %v221_v36 }
  0x13   :  { %2574 = vmatpush3.msra.mxu1 %v115_v10  ;;  %267 = vmatprep.subr.mxu0 %v220_v37 }
  0x14   :  { %367 = vmatprep.subr.mxu1 %v2872_v31  ;;  %268 = vmatpush1.msra.mxu0 %v219_v38 }
  0x15   :  { %269 = vmatprep.subr.mxu0 %v218_v39 }
  0x16   :  { %270 = vmatpush1.msra.mxu0 %v217_v40 }
  0x17   :  { %484 = vmatprep.subr.mxu0 %v2872_v31 }
  0xc4   :  { %v2558_v11 = vpop.f32.mrf.mxu0 }
  0xc5   :  { %v2485_v12 = vmul.f32 -1.442695, %v2558_v11 }
  0xc6   :  { %v94_v13 = vpop.f32.mrf.mxu0 }
  0xc7   :  { %2580 = vpow2.f32 %v2485_v12  ;;  %v2484_v14 = vmul.f32 -1.442695, %v94_v13 }
  0xc9   :  { %2582 = vpow2.f32 %v2484_v14 }
  0xd4   :  { %v2581_v15 = vpop.eup %2580 }
  0xd5   :  { %v110_v17 = vadd.f32 1.0, %v2581_v15  ;;  %v13_v15 = vadd.s32 128, %v12_v5 }
  0xd6   :  { %v2583_v16 = vpop.eup %2582 }
  0xd7   :  { %v109_v18 = vadd.f32 1.0, %v2583_v16 }
  0xd9   :  { %2584 = vrcp.f32 %v109_v18 }
  0xda   :  { %2586 = vrcp.f32 %v110_v17  ;;  %v15_v17 = vand.u32 63, %v13_v15 }
  0xdc   :  { %vm3033_vm3 = vcmp.lt.s32.totalorder %v15_v17, 32 }
  0xe6   :  { %v2585_v19 = vpop.eup %2584 }
  0xe7   :  { %v2587_v20 = vpop.eup %2586  ;;  %2575 = vmatprep.mubr.msk.f32.mxu1 %vm123_vm1, %v2585_v19 }
  0xe8   :  { %2576 = vmatmul.mubr.msk.f32.vlgmr.msra.gmra.mxu1 %vm123_vm1, %v2587_v20 }
  0xe9   :  { %415 = vmatprep.mubr.f32.mxu1 %v2788_v28  ;;  %368 = vmatpush1.msra.mxu1 %v2881_v33 }
  0xea   :  { %369 = vmatprep.subr.mxu1 %v2890_v35 }
  0xeb   :  { %370 = vmatpush1.msra.mxu1 %v2911_v41 }
  0xec   :  { %371 = vmatprep.subr.mxu1 %v2917_v42 }
  0xed   :  { %372 = vmatpush1.msra.mxu1 %v2922_v43 }
  0xee   :  { %373 = vmatprep.subr.mxu1 %v2929_v44 }
  0xef   :  { %374 = vmatpush1.msra.mxu1 %v2936_v45 }
  0xf0   :  { %375 = vmatprep.subr.mxu1 %v2942_v46 }
  0xf1   :  { %376 = vmatpush1.msra.mxu1 %v2947_v47 }
  0xf2   :  { %377 = vmatprep.subr.mxu1 %v2952_v48 }
  0xf3   :  { %378 = vmatpush1.msra.mxu1 %v2958_v49 }
  0xf4   :  { %379 = vmatprep.subr.mxu1 %v2964_v50 }
  0xf5   :  { %380 = vmatpush1.msra.mxu1 %v2970_v51 }
  0xf6   :  { %381 = vmatprep.subr.mxu1 %v2976_v52 }
  0xf7   :  { %382 = vmatpush1.msra.mxu1 %v2982_v53 }
  0xf8   :  { %416 = vmatmul.mubr.f32.vlgmr.msra.gmra.mxu1 %v2788_v28  ;;  %613 = vmatprep.subr.mxu1 %v2872_v31 }
  0xf9   :  { %614 = vmatpush1.msra.mxu1 %v2881_v33  ;;  %661 = vmatprep.mubr.f32.mxu1 %v2788_v28 }
  0xfa   :  { %615 = vmatprep.subr.mxu1 %v2890_v35 }
  0xfb   :  { %616 = vmatpush1.msra.mxu1 %v2911_v41 }
  0xfc   :  { %617 = vmatprep.subr.mxu1 %v2917_v42 }
  0xfd   :  { %618 = vmatpush1.msra.mxu1 %v2922_v43 }
  0xfe   :  { %619 = vmatprep.subr.mxu1 %v2929_v44 }
  0xff   :  { %620 = vmatpush1.msra.mxu1 %v2936_v45 }
 0x100   :  { %621 = vmatprep.subr.mxu1 %v2942_v46 }
 0x101   :  { %622 = vmatpush1.msra.mxu1 %v2947_v47 }
 0x102   :  { %623 = vmatprep.subr.mxu1 %v2952_v48 }
 0x103   :  { %624 = vmatpush1.msra.mxu1 %v2958_v49 }
 0x104   :  { %625 = vmatprep.subr.mxu1 %v2964_v50 }
 0x105   :  { %626 = vmatpush1.msra.mxu1 %v2970_v51 }
 0x106   :  { %627 = vmatprep.subr.mxu1 %v2976_v52 }
 0x107   :  { %628 = vmatpush1.msra.mxu1 %v2982_v53 }
 0x108   :  { %871 = vmatprep.subr.mxu1 %v2872_v31 }
 0x1a8   :  { %v2577_v54 = vpop.f32.mrf.mxu1 }
 0x1a9   :  { %v2489_v55 = vmul.f32 -1.442695, %v2577_v54 }
 0x1aa   :  { %v196_v56 = vpop.f32.mrf.mxu1 }
 0x1ab   :  { %v2488_v57 = vmul.f32 -1.442695, %v196_v56  ;;  %2588 = vpow2.f32 %v2489_v55 }
 0x1ad   :  { %2590 = vpow2.f32 %v2488_v57 }
 0x1b8   :  { %v2589_v58 = vpop.eup %2588  ;;  %v417_v12 = vpop.f32.mrf.mxu1 }
 0x1b9   :  { %v212_v61 = vadd.f32 1.0, %v2589_v58 }
 0x1ba   :  { %v2591_v59 = vpop.eup %2590  ;;  %v419_v22 = vpop.f32.mrf.mxu1 }
 0x1bb   :  { %v211_v60 = vadd.f32 1.0, %v2591_v59 }
 0x1bd   :  { %2592 = vrcp.f32 %v211_v60 }
 0x1be   :  { %2594 = vrcp.f32 %v212_v61 }
 0x1ca   :  { %v2593_v62 = vpop.eup %2592 }
 0x1cb   :  { %2490 = vmatmul.mubr.msk.f32.vlgmr.msra.gmra.mxu0 %vm123_vm1, %v2593_v62  ;;  %v2595_v63 = vpop.eup %2594 }
 0x1cc   :  { %309 = vmatprep.mubr.f32.mxu0 %v2788_v28  ;;  %485 = vmatpush1.msra.mxu0 %v2881_v33 }
 0x1cd   :  { %486 = vmatprep.subr.mxu0 %v2890_v35 }
 0x1ce   :  { %487 = vmatpush1.msra.mxu0 %v2911_v41 }
 0x1cf   :  { %2491 = vmatmul.mubr.msk.f32.gmra.mxu0 %vm123_vm1, %v2595_v63  ;;  %488 = vmatprep.subr.mxu0 %v2917_v42 }
 0x1d0   :  { %489 = vmatpush1.msra.mxu0 %v2922_v43  ;;  %532 = vmatprep.mubr.f32.mxu0 %v2788_v28 }
 0x1d1   :  { %490 = vmatprep.subr.mxu0 %v2929_v44 }
 0x1d2   :  { %491 = vmatpush1.msra.mxu0 %v2936_v45 }
 0x1d3   :  { %492 = vmatprep.subr.mxu0 %v2942_v46 }
 0x1d4   :  { %493 = vmatpush1.msra.mxu0 %v2947_v47 }
 0x1d5   :  { %494 = vmatprep.subr.mxu0 %v2952_v48 }
 0x1d6   :  { %495 = vmatpush1.msra.mxu0 %v2958_v49 }
 0x1d7   :  { %496 = vmatprep.subr.mxu0 %v2964_v50 }
 0x1d8   :  { %497 = vmatpush1.msra.mxu0 %v2970_v51 }
 0x1d9   :  { %498 = vmatprep.subr.mxu0 %v2976_v52 }
 0x1da   :  { %499 = vmatpush1.msra.mxu0 %v2982_v53 }
 0x1db   :  { %742 = vmatprep.subr.mxu0 %v2872_v31 }
 0x28b   :  { %v305_v0 = vpop.f32.mrf.mxu0 }
 0x28c   :  { %316 = vst [vmem:[#allocation2 + $0x10] sm:$0xff] %v305_v0 }
 0x28d   :  { %v307_v1 = vpop.f32.mrf.mxu0 }
 0x28e   :  { %317 = vst [vmem:[#allocation2] sm:$0xff] %v307_v1 }
 0x28f   :  { %v311_v3 = vpop.f32.mrf.mxu0 }
 0x290   :  { %318 = vst [vmem:[#allocation2 + $0x18] sm:$0xff] %v311_v3 }
 0x291   :  { %v313_v4 = vpop.f32.mrf.mxu0 }
 0x292   :  { %319 = vst [vmem:[#allocation2 + $0x8] sm:$0xff] %v313_v4 }
 0x293   :  { %v336_v10 = vld [vmem:[#allocation2 + $0x10] sm:$0x3]  ;;  %v454_v59 = vld [vmem:[#allocation2 + $0x10] sm:$0xc] }
 0x295   :  { %v337_v20 = vld [vmem:[#allocation2] sm:$0x3]  ;;  %v455_v5 = vld [vmem:[#allocation2] sm:$0xc] }
 0x297   :  { %v338_v7 = vld [vmem:[#allocation2 + $0x18] sm:$0xc0]  ;;  %v456_v56 = vld [vmem:[#allocation2 + $0x18] sm:$0x30] }
 0x298   :  { %v342_v8 = vrot.slane %v338_v7, 6  ;;  %v460_v57 = vrot.slane %v456_v56, 2  ;;  %v581_v56 = vld [vmem:[#allocation2] sm:$0x30] }
 0x299   :  { %v339_v16 = vld [vmem:[#allocation2 + $0x8] sm:$0xc0]  ;;  %v457_v0 = vld [vmem:[#allocation2 + $0x8] sm:$0x30] }
 0x29a   :  { %v346_v11 = vsel %vm3027_vm2, %v336_v10, %v342_v8  ;;  %v343_v18 = vrot.slane %v339_v16, 6  ;;  %v464_v61 = vsel %vm3027_vm2, %v454_v59, %v460_v57  ;;  %v461_v3 = vrot.slane %v457_v0, 2 }
 0x29b   :  { %v422_v13 = vadd.f32 %v417_v12, %v346_v11 }
 0x29c   :  { %v347_v21 = vsel %vm3033_vm3, %v337_v20, %v343_v18  ;;  %v465_v6 = vsel %vm3033_vm3, %v455_v5, %v461_v3 }
 0x29d   :  { %v2492_v14 = vmul.f32 -1.442695, %v422_v13  ;;  %v423_v23 = vadd.f32 %v419_v22, %v347_v21 }
 0x29f   :  { %2596 = vpow2.f32 %v2492_v14  ;;  %v2493_v30 = vmul.f32 -1.442695, %v423_v23 }
 0x2a0   :  { %2598 = vtanh.f32 %v423_v23 }
 0x2ac   :  { %v2597_v24 = vpop.eup %2596 }
 0x2ad   :  { %v430_v25 = vadd.f32 1.0, %v2597_v24  ;;  %v2599_v26 = vpop.eup %2598 }
 0x2af   :  { %2600 = vrcp.f32 %v430_v25 }
 0x2b0   :  { %2602 = vpow2.f32 %v2493_v30 }
 0x2bc   :  { %v2601_v27 = vpop.eup %2600 }
 0x2bd   :  { %v438_v29 = vmul.f32 %v2601_v27, %v2599_v26  ;;  %v2603_v32 = vpop.eup %2602  ;;  %v437_v36 = vmul.f32 0.0, %v2601_v27  ;;  %v582_v27 = vld [vmem:[#allocation2 + $0x18] sm:$0xc] }
 0x2be   :  { %v431_v34 = vadd.f32 1.0, %v2603_v32  ;;  %v580_v32 = vld [vmem:[#allocation2 + $0x10] sm:$0x30] }
 0x2bf   :  { %440 = vrot.lane.b32.xlu0 %v438_v29, %s2789_s8  ;;  %v586_v29 = vrot.slane %v582_v27, 6 }
 0x2c0   :  { %2604 = vrcp.f32 %v431_v34 }
 0x2cd   :  { %v2605_v39 = vpop.eup %2604 }
 0x331   :  { %v441_v37 = vpop.permute.xlu0 %440 }
 0x332   :  { %v443_v38 = vadd.f32 %v441_v37, %v437_v36  ;;  %v590_v36 = vsel %vm3027_vm2, %v580_v32, %v586_v29  ;;  %v710_v29 = vld [vmem:[#allocation2] sm:$0xc0] }
 0x334   :  { %2606 = vtanh.f32 %v443_v38  ;;  %v561_v12 = vrot.slane %v443_v38, 6 }
 0x341   :  { %v2607_v40 = vpop.eup %2606 }
 0x342   :  { %v445_v54 = vmul.f32 %v2607_v40, %v2605_v39  ;;  %v583_v39 = vld [vmem:[#allocation2 + $0x8] sm:$0xc] }
 0x344   :  { %447 = vrot.lane.b32.xlu0 %v445_v54, %s2789_s8  ;;  %v587_v54 = vrot.slane %v583_v39, 6 }
 0x346   :  { %v591_v57 = vsel %vm3033_vm3, %v581_v56, %v587_v54 }
 0x3b6   :  { %v448_v55 = vpop.permute.xlu0 %447 }
 0x3b7   :  { %451 = vst.msk [vmem:[#allocation3] sm:$0x3] %vm450_vm4, %v448_v55  ;;  %2494 = vmatmul.mubr.msk.f32.vlgmr.msra.gmra.mxu0 %vm123_vm1, %v448_v55 }
 0x3b8   :  { %453 = vst.msk [vmem:[#allocation3 + $0xe] sm:$0x3] %vm452_vm5, %v448_v55  ;;  %743 = vmatpush1.msra.mxu0 %v2881_v33  ;;  %790 = vmatprep.mubr.f32.mxu0 %v2788_v28 }
 0x3b9   :  { %744 = vmatprep.subr.mxu0 %v2890_v35 }
 0x3ba   :  { %745 = vmatpush1.msra.mxu0 %v2911_v41 }
 0x3bb   :  { %746 = vmatprep.subr.mxu0 %v2917_v42 }
 0x3bc   :  { %747 = vmatpush1.msra.mxu0 %v2922_v43 }
 0x3bd   :  { %748 = vmatprep.subr.mxu0 %v2929_v44 }
 0x3be   :  { %749 = vmatpush1.msra.mxu0 %v2936_v45 }
 0x3bf   :  { %750 = vmatprep.subr.mxu0 %v2942_v46 }
 0x3c0   :  { %751 = vmatpush1.msra.mxu0 %v2947_v47 }
 0x3c1   :  { %752 = vmatprep.subr.mxu0 %v2952_v48 }
 0x3c2   :  { %753 = vmatpush1.msra.mxu0 %v2958_v49 }
 0x3c3   :  { %754 = vmatprep.subr.mxu0 %v2964_v50 }
 0x3c4   :  { %755 = vmatpush1.msra.mxu0 %v2970_v51 }
 0x3c5   :  { %756 = vmatprep.subr.mxu0 %v2976_v52 }
 0x3c6   :  { %757 = vmatpush1.msra.mxu0 %v2982_v53 }
 0x3c7   :  { %989 = vmatprep.subr.mxu0 %v2872_v31 }
 0x477   :  { %v534_v58 = vpop.f32.mrf.mxu0 }
 0x478   :  { %v541_v60 = vrot.slane %v534_v58, 6 }
 0x479   :  { %v536_v1 = vpop.f32.mrf.mxu0 }
 0x47a   :  { %v545_v62 = vadd.f32 %v541_v60, %v464_v61  ;;  %v542_v4 = vrot.slane %v536_v1, 6 }
 0x47c   :  { %v2495_v63 = vmul.f32 -1.442695, %v545_v62  ;;  %v546_v7 = vadd.f32 %v542_v4, %v465_v6 }
 0x47e   :  { %2608 = vpow2.f32 %v2495_v63  ;;  %v2496_v16 = vmul.f32 -1.442695, %v546_v7 }
 0x47f   :  { %2610 = vtanh.f32 %v546_v7 }
 0x48b   :  { %v2609_v8 = vpop.eup %2608 }
 0x48c   :  { %v553_v10 = vadd.f32 1.0, %v2609_v8  ;;  %v2611_v11 = vpop.eup %2610 }
 0x48e   :  { %2612 = vrcp.f32 %v553_v10 }
 0x48f   :  { %2614 = vpow2.f32 %v2496_v16 }
 0x49b   :  { %v2613_v13 = vpop.eup %2612 }
 0x49c   :  { %v564_v14 = vmul.f32 %v2613_v13, %v2611_v11  ;;  %v563_v15 = vmul.f32 %v2613_v13, %v561_v12  ;;  %v2615_v17 = vpop.eup %2614 }
 0x49d   :  { %v554_v18 = vadd.f32 1.0, %v2615_v17  ;;  %v709_v17 = vld [vmem:[#allocation2 + $0x10] sm:$0xc0] }
 0x49e   :  { %566 = vrot.lane.b32.xlu1 %v564_v14, %s2789_s8  ;;  %v711_v14 = vld [vmem:[#allocation2 + $0x18] sm:$0x3] }
 0x49f   :  { %2616 = vrcp.f32 %v554_v18 }
 0x4ac   :  { %v2617_v22 = vpop.eup %2616 }
 0x510   :  { %v567_v20 = vpop.permute.xlu1 %566 }
 0x511   :  { %v569_v21 = vadd.f32 %v567_v20, %v563_v15  ;;  %v715_v15 = vrot.slane %v711_v14, 2 }
 0x513   :  { %2618 = vtanh.f32 %v569_v21  ;;  %v690_v62 = vrot.slane %v569_v21, 6  ;;  %v719_v20 = vsel %vm3027_vm2, %v709_v17, %v715_v15 }
 0x520   :  { %v2619_v23 = vpop.eup %2618 }
 0x521   :  { %v3066_v24 = vmul.f32 %v2619_v23, %v2617_v22  ;;  %v712_v23 = vld [vmem:[#allocation2 + $0x8] sm:$0x3] }
 0x523   :  { %v592_v25 = vrot.slane %v3066_v24, 2 }
 0x525   :  { %593 = vrot.lane.b32.xlu1 %v592_v25, %s2789_s8 }
 0x597   :  { %v594_v26 = vpop.permute.xlu1 %593 }
 0x598   :  { %2497 = vmatmul.mubr.msk.f32.vlgmr.msra.gmra.mxu1 %vm123_vm1, %v594_v26  ;;  %v716_v26 = vrot.slane %v712_v23, 2 }
 0x599   :  { %872 = vmatpush1.msra.mxu1 %v2881_v33  ;;  %919 = vmatprep.mubr.f32.mxu1 %v2788_v28 }
 0x59a   :  { %873 = vmatprep.subr.mxu1 %v2890_v35 }
 0x59b   :  { %874 = vmatpush1.msra.mxu1 %v2911_v41 }
 0x59c   :  { %875 = vmatprep.subr.mxu1 %v2917_v42 }
 0x59d   :  { %876 = vmatpush1.msra.mxu1 %v2922_v43 }
 0x59e   :  { %877 = vmatprep.subr.mxu1 %v2929_v44 }
 0x59f   :  { %878 = vmatpush1.msra.mxu1 %v2936_v45 }
 0x5a0   :  { %879 = vmatprep.subr.mxu1 %v2942_v46 }
 0x5a1   :  { %880 = vmatpush1.msra.mxu1 %v2947_v47 }
 0x5a2   :  { %881 = vmatprep.subr.mxu1 %v2952_v48 }
 0x5a3   :  { %882 = vmatpush1.msra.mxu1 %v2958_v49 }
 0x5a4   :  { %883 = vmatprep.subr.mxu1 %v2964_v50 }
 0x5a5   :  { %884 = vmatpush1.msra.mxu1 %v2970_v51 }
 0x5a6   :  { %885 = vmatprep.subr.mxu1 %v2976_v52 }
 0x5a7   :  { %886 = vmatpush1.msra.mxu1 %v2982_v53 }
 0x5a8   :  { %1116 = vmatprep.subr.mxu1 %v2872_v31 }
 0x658   :  { %v663_v30 = vpop.f32.mrf.mxu1 }
 0x659   :  { %v670_v34 = vrot.slane %v663_v30, 4  ;;  %v720_v30 = vsel %vm3033_vm3, %v710_v29, %v716_v26 }
 0x65a   :  { %v665_v40 = vpop.f32.mrf.mxu1 }
 0x65b   :  { %v674_v37 = vadd.f32 %v670_v34, %v590_v36  ;;  %v671_v55 = vrot.slane %v665_v40, 4 }
 0x65d   :  { %v2498_v38 = vmul.f32 -1.442695, %v674_v37  ;;  %v675_v58 = vadd.f32 %v671_v55, %v591_v57 }
 0x65f   :  { %2620 = vpow2.f32 %v2498_v38  ;;  %v2499_v3 = vmul.f32 -1.442695, %v675_v58 }
 0x660   :  { %2622 = vtanh.f32 %v675_v58 }
 0x66c   :  { %v2621_v59 = vpop.eup %2620 }
 0x66d   :  { %v682_v60 = vadd.f32 1.0, %v2621_v59  ;;  %v2623_v61 = vpop.eup %2622 }
 0x66f   :  { %2624 = vrcp.f32 %v682_v60 }
 0x670   :  { %2626 = vpow2.f32 %v2499_v3 }
 0x67c   :  { %v2625_v63 = vpop.eup %2624 }
 0x67d   :  { %v693_v0 = vmul.f32 %v2625_v63, %v2623_v61  ;;  %v692_v1 = vmul.f32 %v2625_v63, %v690_v62  ;;  %v2627_v4 = vpop.eup %2626 }
 0x67e   :  { %v683_v5 = vadd.f32 1.0, %v2627_v4 }
 0x67f   :  { %695 = vrot.lane.b32.xlu0 %v693_v0, %s2789_s8  ;;  %v840_v0 = vld [vmem:[#allocation2 + $0x10] sm:$0xc0] }
 0x680   :  { %2628 = vrcp.f32 %v683_v5  ;;  %v844_v3 = vrot.slane %v840_v0, 6 }
 0x68d   :  { %v2629_v8 = vpop.eup %2628 }
 0x6f1   :  { %v696_v6 = vpop.permute.xlu0 %695 }
 0x6f2   :  { %v698_v7 = vadd.f32 %v696_v6, %v692_v1  ;;  %v838_v1 = vld [vmem:[#allocation2 + $0x18] sm:$0x3] }
 0x6f3   :  { %v848_v4 = vsel %vm3027_vm2, %v838_v1, %v844_v3 }
 0x6f4   :  { %2630 = vtanh.f32 %v698_v7  ;;  %v819_v37 = vrot.slane %v698_v7, 6 }
 0x701   :  { %v2631_v10 = vpop.eup %2630 }
 0x702   :  { %v3093_v11 = vmul.f32 %v2631_v10, %v2629_v8  ;;  %v841_v8 = vld [vmem:[#allocation2] sm:$0xc0]  ;;  %v839_v10 = vld [vmem:[#allocation2 + $0x8] sm:$0x3] }
 0x704   :  { %v721_v12 = vrot.slane %v3093_v11, 4 }
 0x706   :  { %722 = vrot.lane.b32.xlu1 %v721_v12, %s2789_s8  ;;  %v845_v12 = vrot.slane %v841_v8, 6 }
 0x708   :  { %v849_v14 = vsel %vm3033_vm3, %v839_v10, %v845_v12 }
 0x778   :  { %v723_v13 = vpop.permute.xlu1 %722 }
 0x779   :  { %2500 = vmatmul.mubr.msk.f32.vlgmr.msra.gmra.mxu0 %vm123_vm1, %v723_v13 }
 0x77a   :  { %990 = vmatpush1.msra.mxu0 %v2881_v33  ;;  %1037 = vmatprep.mubr.f32.mxu0 %v2788_v28 }
 0x77b   :  { %991 = vmatprep.subr.mxu0 %v2890_v35 }
 0x77c   :  { %992 = vmatpush1.msra.mxu0 %v2911_v41 }
 0x77d   :  { %993 = vmatprep.subr.mxu0 %v2917_v42 }
 0x77e   :  { %994 = vmatpush1.msra.mxu0 %v2922_v43 }
 0x77f   :  { %995 = vmatprep.subr.mxu0 %v2929_v44 }
 0x780   :  { %996 = vmatpush1.msra.mxu0 %v2936_v45 }
 0x781   :  { %997 = vmatprep.subr.mxu0 %v2942_v46 }
 0x782   :  { %998 = vmatpush1.msra.mxu0 %v2947_v47 }
 0x783   :  { %999 = vmatprep.subr.mxu0 %v2952_v48 }
 0x784   :  { %1000 = vmatpush1.msra.mxu0 %v2958_v49 }
 0x785   :  { %1001 = vmatprep.subr.mxu0 %v2964_v50 }
 0x786   :  { %1002 = vmatpush1.msra.mxu0 %v2970_v51 }
 0x787   :  { %1003 = vmatprep.subr.mxu0 %v2976_v52 }
 0x788   :  { %1004 = vmatpush1.msra.mxu0 %v2982_v53 }
 0x789   :  { %1243 = vmatprep.subr.mxu0 %v2872_v31 }
 0x839   :  { %v792_v16 = vpop.f32.mrf.mxu0 }
 0x83a   :  { %v799_v18 = vrot.slane %v792_v16, 2 }
 0x83b   :  { %v794_v25 = vpop.f32.mrf.mxu0 }
 0x83c   :  { %v803_v21 = vadd.f32 %v799_v18, %v719_v20  ;;  %v800_v27 = vrot.slane %v794_v25, 2 }
 0x83e   :  { %v2501_v22 = vmul.f32 -1.442695, %v803_v21  ;;  %v804_v31 = vadd.f32 %v800_v27, %v720_v30 }
 0x840   :  { %2632 = vpow2.f32 %v2501_v22  ;;  %v2502_v54 = vmul.f32 -1.442695, %v804_v31 }
 0x841   :  { %2634 = vtanh.f32 %v804_v31 }
 0x84d   :  { %v2633_v32 = vpop.eup %2632 }
 0x84e   :  { %v811_v34 = vadd.f32 1.0, %v2633_v32  ;;  %v2635_v36 = vpop.eup %2634 }
 0x850   :  { %2636 = vrcp.f32 %v811_v34 }
 0x851   :  { %2638 = vpow2.f32 %v2502_v54 }
 0x85d   :  { %v2637_v38 = vpop.eup %2636 }
 0x85e   :  { %v822_v39 = vmul.f32 %v2637_v38, %v2635_v36  ;;  %v821_v40 = vmul.f32 %v2637_v38, %v819_v37  ;;  %v2639_v55 = vpop.eup %2638 }
 0x85f   :  { %v812_v56 = vadd.f32 1.0, %v2639_v55 }
 0x860   :  { %824 = vrot.lane.b32.xlu0 %v822_v39, %s2789_s8 }
 0x861   :  { %2640 = vrcp.f32 %v812_v56 }
 0x86e   :  { %v2641_v59 = vpop.eup %2640 }
 0x8d2   :  { %v825_v57 = vpop.permute.xlu0 %824 }
 0x8d3   :  { %v827_v58 = vadd.f32 %v825_v57, %v821_v40 }
 0x8d5   :  { %2642 = vtanh.f32 %v827_v58  ;;  %v942_v20 = vrot.slane %v827_v58, 6 }
 0x8e2   :  { %v2643_v60 = vpop.eup %2642 }
 0x8e3   :  { %v3120_v61 = vmul.f32 %v2643_v60, %v2641_v59 }
 0x8e5   :  { %v850_v62 = vrot.slane %v3120_v61, 6 }
 0x8e7   :  { %851 = vrot.lane.b32.xlu1 %v850_v62, %s2789_s8 }
 0x959   :  { %v852_v63 = vpop.permute.xlu1 %851 }
 0x95a   :  { %2503 = vmatmul.mubr.msk.f32.vlgmr.msra.gmra.mxu1 %vm123_vm1, %v852_v63 }
 0x95b   :  { %1117 = vmatpush1.msra.mxu1 %v2881_v33  ;;  %1164 = vmatprep.mubr.f32.mxu1 %v2788_v28 }
 0x95c   :  { %1118 = vmatprep.subr.mxu1 %v2890_v35 }
 0x95d   :  { %1119 = vmatpush1.msra.mxu1 %v2911_v41 }
 0x95e   :  { %1120 = vmatprep.subr.mxu1 %v2917_v42 }
 0x95f   :  { %1121 = vmatpush1.msra.mxu1 %v2922_v43 }
 0x960   :  { %1122 = vmatprep.subr.mxu1 %v2929_v44 }
 0x961   :  { %1123 = vmatpush1.msra.mxu1 %v2936_v45 }
 0x962   :  { %1124 = vmatprep.subr.mxu1 %v2942_v46 }
 0x963   :  { %1125 = vmatpush1.msra.mxu1 %v2947_v47 }
 0x964   :  { %1126 = vmatprep.subr.mxu1 %v2952_v48 }
 0x965   :  { %1127 = vmatpush1.msra.mxu1 %v2958_v49 }
 0x966   :  { %1128 = vmatprep.subr.mxu1 %v2964_v50 }
 0x967   :  { %1129 = vmatpush1.msra.mxu1 %v2970_v51 }
 0x968   :  { %1130 = vmatprep.subr.mxu1 %v2976_v52 }
 0x969   :  { %1131 = vmatpush1.msra.mxu1 %v2982_v53 }
 0xa1a   :  { %v921_v5 = vpop.f32.mrf.mxu1 }
 0xa1b   :  { %v926_v6 = vadd.f32 %v921_v5, %v848_v4  ;;  %v1085_v5 = vld [vmem:[#allocation2 + $0x10] sm:$0xc] }
 0xa1c   :  { %v923_v13 = vpop.f32.mrf.mxu1 }
 0xa1d   :  { %v2504_v7 = vmul.f32 -1.442695, %v926_v6  ;;  %v927_v15 = vadd.f32 %v923_v13, %v849_v14  ;;  %v1083_v6 = vld [vmem:[#allocation2 + $0x18] sm:$0x30] }
 0xa1f   :  { %2644 = vpow2.f32 %v2504_v7  ;;  %v2505_v25 = vmul.f32 -1.442695, %v927_v15  ;;  %v1089_v7 = vrot.slane %v1085_v5, 6  ;;  %v1353_v5 = vld [vmem:[%s3599_s1 + $0x200] sm:$0xff] }
 0xa20   :  { %2646 = vtanh.f32 %v927_v15 }
 0xa21   :  { %v1093_v12 = vsel %vm3027_vm2, %v1083_v6, %v1089_v7  ;;  %v1352_v6 = vld [vmem:[%s3599_s1 + $0x1f8] sm:$0xff]  ;;  %v1351_v7 = vld [vmem:[%s3599_s1 + $0x1f0] sm:$0xff] }
 0xa2c   :  { %v2645_v16 = vpop.eup %2644 }
 0xa2d   :  { %v934_v17 = vadd.f32 1.0, %v2645_v16  ;;  %v2647_v18 = vpop.eup %2646  ;;  %v1086_v16 = vld [vmem:[#allocation2] sm:$0xc] }
 0xa2f   :  { %2648 = vrcp.f32 %v934_v17  ;;  %v1084_v17 = vld [vmem:[#allocation2 + $0x8] sm:$0x30] }
 0xa30   :  { %2650 = vpow2.f32 %v2505_v25 }
 0xa3c   :  { %v2649_v21 = vpop.eup %2648 }
 0xa3d   :  { %v945_v22 = vmul.f32 %v2649_v21, %v2647_v18  ;;  %v944_v23 = vmul.f32 %v2649_v21, %v942_v20  ;;  %v2651_v26 = vpop.eup %2650  ;;  %v1090_v20 = vrot.slane %v1086_v16, 6 }
 0xa3e   :  { %v935_v27 = vadd.f32 1.0, %v2651_v26 }
 0xa3f   :  { %947 = vrot.lane.b32.xlu0 %v945_v22, %s2789_s8  ;;  %v1094_v21 = vsel %vm3033_vm3, %v1084_v17, %v1090_v20  ;;  %v1345_v20 = vld [vmem:[%s3599_s1 + $0x1c0] sm:$0xff] }
 0xa40   :  { %2652 = vrcp.f32 %v935_v27 }
 0xa4d   :  { %v2653_v31 = vpop.eup %2652 }
 0xab1   :  { %v948_v29 = vpop.permute.xlu0 %947 }
 0xab2   :  { %v950_v30 = vadd.f32 %v948_v29, %v944_v23 }
 0xab4   :  { %2654 = vtanh.f32 %v950_v30  ;;  %v1066_v40 = vrot.slane %v950_v30, 6 }
 0xac1   :  { %v2655_v32 = vpop.eup %2654 }
 0xac2   :  { %v952_v34 = vmul.f32 %v2655_v32, %v2653_v31 }
 0xac4   :  { %954 = vrot.lane.b32.xlu1 %v952_v34, %s2789_s8 }
 0xb36   :  { %v3147_v36 = vpop.permute.xlu1 %954 }
 0xb37   :  { %2506 = vmatmul.mubr.msk.f32.vlgmr.msra.gmra.mxu0 %vm123_vm1, %v3147_v36 }
 0xb38   :  { %1244 = vmatpush1.msra.mxu0 %v2881_v33  ;;  %1291 = vmatprep.mubr.f32.mxu0 %v2788_v28  ;;  %v961_v33 = vld [vmem:[#allocation2 + $0x10] sm:$0x30] }
 0xb39   :  { %1245 = vmatprep.subr.mxu0 %v2890_v35  ;;  %v959_v35 = vld [vmem:[#allocation2 + $0x18] sm:$0xc] }
 0xb3a   :  { %1246 = vmatpush1.msra.mxu0 %v2911_v41  ;;  %v965_v41 = vrot.slane %v961_v33, 2 }
 0xb3b   :  { %1247 = vmatprep.subr.mxu0 %v2917_v42 }
 0xb3c   :  { %1248 = vmatpush1.msra.mxu0 %v2922_v43 }
 0xb3d   :  { %1249 = vmatprep.subr.mxu0 %v2929_v44  ;;  %v969_v44 = vsel %vm3027_vm2, %v959_v35, %v965_v41 }
 0xb3e   :  { %1250 = vmatpush1.msra.mxu0 %v2936_v45 }
 0xb3f   :  { %1251 = vmatprep.subr.mxu0 %v2942_v46 }
 0xb40   :  { %1252 = vmatpush1.msra.mxu0 %v2947_v47 }
 0xb41   :  { %1253 = vmatprep.subr.mxu0 %v2952_v48  ;;  %v962_v48 = vld [vmem:[#allocation2] sm:$0x30] }
 0xb42   :  { %1254 = vmatpush1.msra.mxu0 %v2958_v49  ;;  %v960_v49 = vld [vmem:[#allocation2 + $0x8] sm:$0xc] }
 0xb43   :  { %1255 = vmatprep.subr.mxu0 %v2964_v50 }
 0xb44   :  { %1256 = vmatpush1.msra.mxu0 %v2970_v51  ;;  %v966_v51 = vrot.slane %v962_v48, 2  ;;  %v1212_v48 = vld [vmem:[#allocation2 + $0x10] sm:$0x3] }
 0xb45   :  { %1257 = vmatprep.subr.mxu0 %v2976_v52 }
 0xb46   :  { %1258 = vmatpush1.msra.mxu0 %v2982_v53  ;;  %v970_v52 = vsel %vm3033_vm3, %v960_v49, %v966_v51  ;;  %v1210_v49 = vld [vmem:[#allocation2 + $0x18] sm:$0xc0] }
 0xbf7   :  { %v1039_v42 = vpop.f32.mrf.mxu0 }
 0xbf8   :  { %v1046_v43 = vrot.slane %v1039_v42, 6 }
 0xbf9   :  { %v1041_v47 = vpop.f32.mrf.mxu0 }
 0xbfa   :  { %v1050_v45 = vadd.f32 %v1046_v43, %v969_v44  ;;  %v1047_v50 = vrot.slane %v1041_v47, 6 }
 0xbfc   :  { %v2507_v46 = vmul.f32 -1.442695, %v1050_v45  ;;  %v1051_v53 = vadd.f32 %v1047_v50, %v970_v52  ;;  %v1216_v50 = vrot.slane %v1212_v48, 2  ;;  %v3337_v48 = vld [vmem:[%s3599_s1 + $0x228] sm:$0xff] }
 0xbfe   :  { %2656 = vpow2.f32 %v2507_v46  ;;  %v2508_v57 = vmul.f32 -1.442695, %v1051_v53 }
 0xbff   :  { %2658 = vtanh.f32 %v1051_v53  ;;  %v1220_v53 = vsel %vm3027_vm2, %v1210_v49, %v1216_v50  ;;  %v3343_v49 = vld [vmem:[%s3599_s1 + $0x220] sm:$0xff]  ;;  %v3349_v50 = vld [vmem:[%s3599_s1 + $0x218] sm:$0xff] }
 0xc0b   :  { %v2657_v37 = vpop.eup %2656 }
 0xc0c   :  { %v1058_v38 = vadd.f32 1.0, %v2657_v37  ;;  %v2659_v39 = vpop.eup %2658 }
 0xc0e   :  { %2660 = vrcp.f32 %v1058_v38 }
 0xc0f   :  { %2662 = vpow2.f32 %v2508_v57 }
 0xc1b   :  { %v2661_v54 = vpop.eup %2660 }
 0xc1c   :  { %v1069_v55 = vmul.f32 %v2661_v54, %v2659_v39  ;;  %v1068_v56 = vmul.f32 %v2661_v54, %v1066_v40  ;;  %v2663_v58 = vpop.eup %2662  ;;  %v1211_v40 = vld [vmem:[#allocation2 + $0x8] sm:$0xc0] }
 0xc1d   :  { %v1059_v59 = vadd.f32 1.0, %v2663_v58 }
 0xc1e   :  { %1071 = vrot.lane.b32.xlu0 %v1069_v55, %s2789_s8 }
 0xc1f   :  { %2664 = vrcp.f32 %v1059_v59 }
 0xc2c   :  { %v2665_v63 = vpop.eup %2664 }
 0xc90   :  { %v1072_v60 = vpop.permute.xlu0 %1071 }
 0xc91   :  { %v1074_v62 = vadd.f32 %v1072_v60, %v1068_v56 }
 0xc93   :  { %2666 = vtanh.f32 %v1074_v62  ;;  %v1193_v27 = vrot.slane %v1074_v62, 6 }
 0xca0   :  { %v2667_v0 = vpop.eup %2666 }
 0xca1   :  { %v3172_v1 = vmul.f32 %v2667_v0, %v2665_v63 }
 0xca3   :  { %v1095_v3 = vrot.slane %v3172_v1, 2 }
 0xca5   :  { %1096 = vrot.lane.b32.xlu1 %v1095_v3, %s2789_s8 }
 0xd17   :  { %v1097_v4 = vpop.permute.xlu1 %1096 }
 0xd18   :  { %2509 = vmatmul.mubr.msk.f32.vlgmr.msra.gmra.mxu1 %vm123_vm1, %v1097_v4  ;;  %v1354_v4 = vld [vmem:[%s3599_s1 + $0x208] sm:$0xff] }
 0xd19   :  { %1438 = vmatprep.mubr.f32.mxu1 %v2788_v28  ;;  %1390 = vmatprep.subr.mxu1 %v1354_v4 }
 0xd1a   :  { %1391 = vmatpush1.msra.mxu1 %v1353_v5 }
 0xd1b   :  { %1392 = vmatprep.subr.mxu1 %v1352_v6 }
 0xd1c   :  { %1393 = vmatpush1.msra.mxu1 %v1351_v7 }
 0xdd8   :  { %v1166_v8 = vpop.f32.mrf.mxu1 }
 0xdd9   :  { %v1173_v10 = vrot.slane %v1166_v8, 4  ;;  %v1349_v8 = vld [vmem:[%s3599_s1 + $0x1e0] sm:$0xff] }
 0xdda   :  { %v1168_v15 = vpop.f32.mrf.mxu1 }
 0xddb   :  { %v1177_v13 = vadd.f32 %v1173_v10, %v1093_v12  ;;  %v1174_v18 = vrot.slane %v1168_v15, 4  ;;  %v1348_v10 = vld [vmem:[%s3599_s1 + $0x1d8] sm:$0xff]  ;;  %v1347_v12 = vld [vmem:[%s3599_s1 + $0x1d0] sm:$0xff] }
 0xddd   :  { %v2510_v14 = vmul.f32 -1.442695, %v1177_v13  ;;  %v1178_v22 = vadd.f32 %v1174_v18, %v1094_v21  ;;  %v1346_v18 = vld [vmem:[%s3599_s1 + $0x1c8] sm:$0xff]  ;;  %v1344_v21 = vld [vmem:[%s3599_s1 + $0x1b8] sm:$0xff] }
 0xddf   :  { %2668 = vpow2.f32 %v2510_v14  ;;  %v2511_v32 = vmul.f32 -1.442695, %v1178_v22 }
 0xde0   :  { %2670 = vtanh.f32 %v1178_v22  ;;  %v1343_v22 = vld [vmem:[%s3599_s1 + $0x1b0] sm:$0xff] }
 0xdec   :  { %v2669_v23 = vpop.eup %2668 }
 0xded   :  { %v1185_v25 = vadd.f32 1.0, %v2669_v23  ;;  %v2671_v26 = vpop.eup %2670 }
 0xdef   :  { %2672 = vrcp.f32 %v1185_v25  ;;  %v1342_v25 = vld [vmem:[%s3599_s1 + $0x1a8] sm:$0xff] }
 0xdf0   :  { %2674 = vpow2.f32 %v2511_v32  ;;  %v3276_v32 = vld [vmem:[%s3599_s1 + $0x278] sm:$0xff] }
 0xdfc   :  { %v2673_v29 = vpop.eup %2672 }
 0xdfd   :  { %v1196_v30 = vmul.f32 %v2673_v29, %v2671_v26  ;;  %v1195_v31 = vmul.f32 %v2673_v29, %v1193_v27  ;;  %v2675_v34 = vpop.eup %2674  ;;  %v3254_v26 = vld [vmem:[%s3599_s1 + $0x288] sm:$0xff]  ;;  %v1341_v27 = vld [vmem:[%s3599_s1 + $0x1a0] sm:$0xff]  ;;  %v1340_v29 = vld [vmem:[%s3599_s1 + $0x198] sm:$0xff] }
 0xdfe   :  { %v1186_v33 = vadd.f32 1.0, %v2675_v34  ;;  %1499 = vmatprep.subr.mxu0 %v3254_v26  ;;  %v3281_v34 = vld [vmem:[%s3599_s1 + $0x270] sm:$0xff] }
 0xdff   :  { %1198 = vrot.lane.b32.xlu0 %v1196_v30, %s2789_s8  ;;  %v1339_v30 = vld [vmem:[%s3599_s1 + $0x190] sm:$0xff] }
 0xe00   :  { %2676 = vrcp.f32 %v1186_v33 }
 0xe0d   :  { %v2677_v42 = vpop.eup %2676 }
 0xe71   :  { %v1199_v35 = vpop.permute.xlu0 %1198 }
 0xe72   :  { %v1201_v41 = vadd.f32 %v1199_v35, %v1195_v31  ;;  %v3271_v31 = vld [vmem:[%s3599_s1 + $0x280] sm:$0xff]  ;;  %v3287_v35 = vld [vmem:[%s3599_s1 + $0x268] sm:$0xff] }
 0xe74   :  { %2678 = vtanh.f32 %v1201_v41  ;;  %v1320_v62 = vrot.slane %v1201_v41, 6 }
 0xe81   :  { %v2679_v43 = vpop.eup %2678 }
 0xe82   :  { %v1203_v44 = vmul.f32 %v2679_v43, %v2677_v42  ;;  %v3296_v43 = vld [vmem:[%s3599_s1 + $0x260] sm:$0xff] }
 0xe84   :  { %v1222_v45 = vrot.slane %v1203_v44, 4 }
 0xe86   :  { %1223 = vrot.lane.b32.xlu1 %v1222_v45, %s2789_s8  ;;  %v3306_v45 = vld [vmem:[%s3599_s1 + $0x250] sm:$0xff] }
 0xe8a   :  { %573 = vrot.lane.b32.xlu1 %v3066_v24, %s2789_s8 }
 0xe8e   :  { %831 = vrot.lane.b32.xlu1 %v3120_v61, %s2789_s8 }
 0xe92   :  { %1205 = vrot.lane.b32.xlu1 %v1203_v44, %s2789_s8  ;;  %v3301_v44 = vld [vmem:[%s3599_s1 + $0x258] sm:$0xff] }
 0xef8   :  { %v1224_v46 = vpop.permute.xlu1 %1223 }
 0xef9   :  { %2512 = vmatmul.mubr.msk.f32.vlgmr.msra.gmra.mxu0 %vm123_vm1, %v1224_v46  ;;  %v3313_v46 = vld [vmem:[%s3599_s1 + $0x248] sm:$0xff] }
 0xefa   :  { %1547 = vmatprep.mubr.f32.mxu0 %v2788_v28  ;;  %1500 = vmatpush1.msra.mxu0 %v3271_v31 }
 0xefb   :  { %1501 = vmatprep.subr.mxu0 %v3276_v32 }
 0xefc   :  { %v574_v47 = vpop.permute.xlu1 %573  ;;  %1502 = vmatpush1.msra.mxu0 %v3281_v34 }
 0xefd   :  { %577 = vst.msk [vmem:[#allocation3] sm:$0xc] %vm576_vm6, %v574_v47  ;;  %1503 = vmatprep.subr.mxu0 %v3287_v35 }
 0xefe   :  { %579 = vst.msk [vmem:[#allocation3 + $0xa] sm:$0xc] %vm578_vm7, %v574_v47  ;;  %1504 = vmatpush1.msra.mxu0 %v3296_v43  ;;  %v3319_v47 = vld [vmem:[%s3599_s1 + $0x240] sm:$0xff] }
 0xeff   :  { %1505 = vmatprep.subr.mxu0 %v3301_v44 }
 0xf00   :  { %v832_v24 = vpop.permute.xlu1 %831  ;;  %1506 = vmatpush1.msra.mxu0 %v3306_v45 }
 0xf01   :  { %835 = vst.msk [vmem:[#allocation3] sm:$0xc0] %vm834_vm8, %v832_v24  ;;  %1507 = vmatprep.subr.mxu0 %v3313_v46 }
 0xf02   :  { %837 = vst.msk [vmem:[#allocation3 + $0x2] sm:$0xc0] %vm836_vm9, %v832_v24  ;;  %v3325_v24 = vld [vmem:[%s3599_s1 + $0x238] sm:$0xff]  ;;  %1508 = vmatpush1.msra.mxu0 %v3319_v47 }
 0xf03   :  { %957 = vst.msk [vmem:[#allocation3 + $0x8] sm:$0x3] %vm450_vm4, %v3147_v36  ;;  %1509 = vmatprep.subr.mxu0 %v3325_v24 }
 0xf04   :  { %958 = vst.msk [vmem:[#allocation3 + $0x6] sm:$0x3] %vm452_vm5, %v3147_v36  ;;  %v1206_v61 = vpop.permute.xlu1 %1205  ;;  %v1213_v36 = vld [vmem:[#allocation2] sm:$0x3] }
 0xf05   :  { %1208 = vst.msk [vmem:[#allocation3 + $0x8] sm:$0x30] %vm705_vm10, %v1206_v61  ;;  %v1217_v55 = vrot.slane %v1213_v36, 2  ;;  %v2515_v36 = vld [vmem:[%s3599_s1 + $0x290] ss:$8 sm:$0x3] }
 0xf06   :  { %1209 = vst.msk [vmem:[#allocation3 - $0x2] sm:$0x30] %vm707_vm11, %v1206_v61  ;;  %v3331_v61 = vld [vmem:[%s3599_s1 + $0x230] sm:$0xff] }
 0xf07   :  { %v1221_v56 = vsel %vm3033_vm3, %v1211_v40, %v1217_v55  ;;  %1510 = vmatpush1.msra.mxu0 %v3331_v61 }
 0xf08   :  { %1511 = vmatprep.subr.mxu0 %v3337_v48 }
 0xf09   :  { %1512 = vmatpush1.msra.mxu0 %v3343_v49 }
 0xf0a   :  { %1513 = vmatprep.subr.mxu0 %v3349_v50 }
 0xfb9   :  { %v1293_v51 = vpop.f32.mrf.mxu0 }
 0xfba   :  { %v1300_v52 = vrot.slane %v1293_v51, 2  ;;  %v3355_v51 = vld [vmem:[%s3599_s1 + $0x210] sm:$0xff] }
 0xfbb   :  { %v1295_v39 = vpop.f32.mrf.mxu0  ;;  %1514 = vmatpush1.msra.mxu0 %v3355_v51 }
 0xfbc   :  { %v1304_v37 = vadd.f32 %v1300_v52, %v1220_v53  ;;  %v1301_v54 = vrot.slane %v1295_v39, 2  ;;  %1548 = vmatmul.mubr.f32.vlgmr.msra.gmra.mxu0 %v2788_v28  ;;  %1741 = vmatprep.subr.mxu0 %v3254_v26 }
 0xfbd   :  { %1742 = vmatpush1.msra.mxu0 %v3271_v31  ;;  %1789 = vmatprep.mubr.f32.mxu0 %v2788_v28 }
 0xfbe   :  { %v2513_v38 = vmul.f32 -1.442695, %v1304_v37  ;;  %v1305_v57 = vadd.f32 %v1301_v54, %v1221_v56  ;;  %1743 = vmatprep.subr.mxu0 %v3276_v32 }
 0xfbf   :  { %1744 = vmatpush1.msra.mxu0 %v3281_v34 }
 0xfc0   :  { %2680 = vpow2.f32 %v2513_v38  ;;  %v2514_v13 = vmul.f32 -1.442695, %v1305_v57  ;;  %1745 = vmatprep.subr.mxu0 %v3287_v35  ;;  %v1359_v38 = vshrl.u32 %v11_v2, 7 }
 0xfc1   :  { %2682 = vtanh.f32 %v1305_v57  ;;  %1746 = vmatpush1.msra.mxu0 %v3296_v43 }
 0xfc2   :  { %1747 = vmatprep.subr.mxu0 %v3301_v44  ;;  %v1360_v39 = vsub.s32 0, %v1359_v38  ;;  %v1364_v40 = vsub.s32 1, %v1359_v38 }
 0xfc3   :  { %1748 = vmatpush1.msra.mxu0 %v3306_v45 }
 0xfc4   :  { %1749 = vmatprep.subr.mxu0 %v3313_v46  ;;  %v1361_v54 = vrot.slane %v2515_v36, %v1360_v39  ;;  %v1365_v55 = vrot.slane %v2515_v36, %v1364_v40 }
 0xfc5   :  { %1750 = vmatpush1.msra.mxu0 %v3319_v47 }
 0xfc6   :  { %1751 = vmatprep.subr.mxu0 %v3325_v24 }
 0xfc7   :  { %1752 = vmatpush1.msra.mxu0 %v3331_v61 }
 0xfc8   :  { %1753 = vmatprep.subr.mxu0 %v3337_v48 }
 0xfc9   :  { %1754 = vmatpush1.msra.mxu0 %v3343_v49 }
 0xfca   :  { %1755 = vmatprep.subr.mxu0 %v3349_v50 }
 0xfcb   :  { %1756 = vmatpush1.msra.mxu0 %v3355_v51 }
 0xfcc   :  { %1995 = vmatprep.subr.mxu0 %v3254_v26 }
 0xfcd   :  { %v2681_v58 = vpop.eup %2680 }
 0xfce   :  { %v1312_v59 = vadd.f32 1.0, %v2681_v58  ;;  %v2683_v60 = vpop.eup %2682 }
 0xfd0   :  { %2684 = vrcp.f32 %v1312_v59 }
 0xfd1   :  { %2686 = vpow2.f32 %v2514_v13 }
 0xfdd   :  { %v2685_v63 = vpop.eup %2684 }
 0xfde   :  { %v1323_v0 = vmul.f32 %v2685_v63, %v2683_v60  ;;  %v1322_v3 = vmul.f32 %v2685_v63, %v1320_v62 }
 0xfe0   :  { %1325 = vrot.lane.b32.xlu0 %v1323_v0, %s2789_s8 }
 0xfe4   :  { %702 = vrot.lane.b32.xlu0 %v3093_v11, %s2789_s8  ;;  %v1350_v11 = vld [vmem:[%s3599_s1 + $0x1e8] sm:$0xff] }
 0xfe5   :  { %1394 = vmatprep.subr.mxu1 %v1350_v11 }
 0xfe6   :  { %1395 = vmatpush1.msra.mxu1 %v1349_v8 }
 0xfe7   :  { %1396 = vmatprep.subr.mxu1 %v1348_v10 }
 0xfe8   :  { %1078 = vrot.lane.b32.xlu0 %v3172_v1, %s2789_s8  ;;  %1397 = vmatpush1.msra.mxu1 %v1347_v12  ;;  %v2687_v1 = vpop.eup %2686 }
 0xfe9   :  { %v1313_v14 = vadd.f32 1.0, %v2687_v1  ;;  %1398 = vmatprep.subr.mxu1 %v1346_v18 }
 0xfea   :  { %1399 = vmatpush1.msra.mxu1 %v1345_v20 }
 0xfeb   :  { %2688 = vrcp.f32 %v1313_v14  ;;  %1400 = vmatprep.subr.mxu1 %v1344_v21 }
 0xfec   :  { %1401 = vmatpush1.msra.mxu1 %v1343_v22 }
 0xfed   :  { %1402 = vmatprep.subr.mxu1 %v1342_v25 }
 0xfee   :  { %1403 = vmatpush1.msra.mxu1 %v1341_v27 }
 0xfef   :  { %1404 = vmatprep.subr.mxu1 %v1340_v29 }
 0xff0   :  { %1405 = vmatpush1.msra.mxu1 %v1339_v30 }
 0xff1   :  { %1614 = vmatprep.subr.mxu1 %v3254_v26 }
 0xff8   :  { %v2689_v33 = vpop.eup %2688 }
0x1052   :  { %v1326_v15 = vpop.permute.xlu0 %1325 }
0x1053   :  { %v1328_v16 = vadd.f32 %v1326_v15, %v1322_v3 }
0x1055   :  { %2690 = vtanh.f32 %v1328_v16 }
0x1056   :  { %v703_v17 = vpop.permute.xlu0 %702 }
0x1057   :  { %706 = vst.msk [vmem:[#allocation3] sm:$0x30] %vm705_vm10, %v703_v17 }
0x1058   :  { %708 = vst.msk [vmem:[#allocation3 + $0x6] sm:$0x30] %vm707_vm11, %v703_v17 }
0x105a   :  { %v1079_v23 = vpop.permute.xlu0 %1078 }
0x105b   :  { %1081 = vst.msk [vmem:[#allocation3 + $0x8] sm:$0xc] %vm576_vm6, %v1079_v23 }
0x105c   :  { %1082 = vst.msk [vmem:[#allocation3 + $0x2] sm:$0xc] %vm578_vm7, %v1079_v23 }
0x1062   :  { %v2691_v41 = vpop.eup %2690 }
0x1063   :  { %v1330_v42 = vmul.f32 %v2691_v41, %v2689_v33 }
0x1065   :  { %1332 = vrot.lane.b32.xlu0 %v1330_v42, %s2789_s8 }
0x107c   :  { %v1549_v6 = vpop.f32.mrf.mxu0 }
0x107e   :  { %v1551_v1 = vpop.f32.mrf.mxu0 }
0x10d7   :  { %v1333_v52 = vpop.permute.xlu0 %1332 }
0x10d8   :  { %1335 = vst.msk [vmem:[#allocation3 + $0x8] sm:$0xc0] %vm834_vm8, %v1333_v52 }
0x10d9   :  { %1336 = vst.msk [vmem:[#allocation3 - $0x6] sm:$0xc0] %vm836_vm9, %v1333_v52 }
0x10df   :  { %v1338_v37 = vld [vmem:[#allocation3 + $0x8] sm:$0xff] }
0x10e0   :  { %v1337_v53 = vld [vmem:[#allocation3] sm:$0xff] }
0x10e1   :  { %2516 = vmatmul.mubr.msk.f32.vlgmr.msra.gmra.mxu1 %vm123_vm1, %v1337_v53 }
0x10e2   :  { %1444 = vmatprep.mubr.f32.mxu1 %v2788_v28  ;;  %1615 = vmatpush1.msra.mxu1 %v3271_v31 }
0x10e3   :  { %1616 = vmatprep.subr.mxu1 %v3276_v32 }
0x10e4   :  { %1617 = vmatpush1.msra.mxu1 %v3281_v34 }
0x10e5   :  { %2517 = vmatmul.mubr.msk.f32.gmra.mxu1 %vm123_vm1, %v1338_v37  ;;  %1618 = vmatprep.subr.mxu1 %v3287_v35 }
0x10e6   :  { %1619 = vmatpush1.msra.mxu1 %v3296_v43  ;;  %1662 = vmatprep.mubr.f32.mxu1 %v2788_v28 }
0x10e7   :  { %1620 = vmatprep.subr.mxu1 %v3301_v44 }
0x10e8   :  { %1621 = vmatpush1.msra.mxu1 %v3306_v45 }
0x10e9   :  { %1622 = vmatprep.subr.mxu1 %v3313_v46 }
0x10ea   :  { %1623 = vmatpush1.msra.mxu1 %v3319_v47 }
0x10eb   :  { %1624 = vmatprep.subr.mxu1 %v3325_v24 }
0x10ec   :  { %1625 = vmatpush1.msra.mxu1 %v3331_v61 }
0x10ed   :  { %1626 = vmatprep.subr.mxu1 %v3337_v48 }
0x10ee   :  { %1627 = vmatpush1.msra.mxu1 %v3343_v49 }
0x10ef   :  { %1628 = vmatprep.subr.mxu1 %v3349_v50 }
0x10f0   :  { %1629 = vmatpush1.msra.mxu1 %v3355_v51 }
0x10f1   :  { %1868 = vmatprep.subr.mxu1 %v3254_v26 }
0x11a1   :  { %v1440_v56 = vpop.f32.mrf.mxu1 }
0x11a2   :  { %v1441_v57 = vadd.f32 %v1440_v56, %v1361_v54 }
0x11a3   :  { %v1442_v58 = vpop.f32.mrf.mxu1 }
0x11a4   :  { %1451 = vst [vmem:[#allocation2 + $0x10] sm:$0xff] %v1441_v57  ;;  %v1443_v59 = vadd.f32 %v1442_v58, %v1365_v55 }
0x11a5   :  { %v1446_v60 = vpop.f32.mrf.mxu1 }
0x11a6   :  { %1452 = vst [vmem:[#allocation2] sm:$0xff] %v1443_v59  ;;  %v1447_v62 = vadd.f32 %v1446_v60, %v1361_v54 }
0x11a7   :  { %v1448_v63 = vpop.f32.mrf.mxu1 }
0x11a8   :  { %1453 = vst [vmem:[#allocation2 + $0x18] sm:$0xff] %v1447_v62  ;;  %v1449_v0 = vadd.f32 %v1448_v63, %v1365_v55 }
0x11aa   :  { %1454 = vst [vmem:[#allocation2 + $0x8] sm:$0xff] %v1449_v0 }
0x11ab   :  { %v1471_v4 = vld [vmem:[#allocation2 + $0x10] sm:$0x3]  ;;  %v1584_v38 = vld [vmem:[#allocation2 + $0x10] sm:$0xc] }
0x11ad   :  { %v1472_v12 = vld [vmem:[#allocation2] sm:$0x3]  ;;  %v1585_v59 = vld [vmem:[#allocation2] sm:$0xc] }
0x11af   :  { %v1473_v2 = vld [vmem:[#allocation2 + $0x18] sm:$0xc0]  ;;  %v1586_v52 = vld [vmem:[#allocation2 + $0x18] sm:$0x30] }
0x11b0   :  { %v1477_v3 = vrot.slane %v1473_v2, 6  ;;  %v1590_v53 = vrot.slane %v1586_v52, 2 }
0x11b1   :  { %v1474_v8 = vld [vmem:[#allocation2 + $0x8] sm:$0xc0]  ;;  %v1587_v55 = vld [vmem:[#allocation2 + $0x8] sm:$0x30] }
0x11b2   :  { %v1481_v5 = vsel %vm3027_vm2, %v1471_v4, %v1477_v3  ;;  %v1478_v10 = vrot.slane %v1474_v8, 6  ;;  %v1594_v36 = vsel %vm3027_vm2, %v1584_v38, %v1590_v53  ;;  %v1591_v57 = vrot.slane %v1587_v55, 2 }
0x11b3   :  { %v1554_v7 = vadd.f32 %v1549_v6, %v1481_v5 }
0x11b4   :  { %v1482_v13 = vsel %vm3033_vm3, %v1472_v12, %v1478_v10  ;;  %v1595_v60 = vsel %vm3033_vm3, %v1585_v59, %v1591_v57 }
0x11b5   :  { %v2518_v11 = vmul.f32 -1.442695, %v1554_v7  ;;  %v1555_v14 = vadd.f32 %v1551_v1, %v1482_v13 }
0x11b7   :  { %2692 = vpow2.f32 %v2518_v11  ;;  %v2519_v21 = vmul.f32 -1.442695, %v1555_v14 }
0x11b8   :  { %2694 = vtanh.f32 %v1555_v14 }
0x11c4   :  { %v2693_v15 = vpop.eup %2692 }
0x11c5   :  { %v1562_v16 = vadd.f32 1.0, %v2693_v15  ;;  %v2695_v17 = vpop.eup %2694 }
0x11c7   :  { %2696 = vrcp.f32 %v1562_v16 }
0x11c8   :  { %2698 = vpow2.f32 %v2519_v21  ;;  %v1708_v21 = vld [vmem:[#allocation2 + $0x10] sm:$0x30] }
0x11d4   :  { %v2697_v18 = vpop.eup %2696 }
0x11d5   :  { %v1570_v20 = vmul.f32 %v2697_v18, %v2695_v17  ;;  %v2699_v22 = vpop.eup %2698  ;;  %v1569_v25 = vmul.f32 0.0, %v2697_v18  ;;  %v1710_v17 = vld [vmem:[#allocation2 + $0x18] sm:$0xc] }
0x11d6   :  { %v1563_v23 = vadd.f32 1.0, %v2699_v22  ;;  %v1714_v18 = vrot.slane %v1710_v17, 6  ;;  %v1836_v17 = vld [vmem:[#allocation2] sm:$0xc0] }
0x11d7   :  { %1572 = vrot.lane.b32.xlu1 %v1570_v20, %s2789_s8 }
0x11d8   :  { %2700 = vrcp.f32 %v1563_v23  ;;  %v1718_v23 = vsel %vm3027_vm2, %v1708_v21, %v1714_v18 }
0x11e5   :  { %v2701_v30 = vpop.eup %2700 }
0x1249   :  { %v1573_v27 = vpop.permute.xlu1 %1572 }
0x124a   :  { %v1575_v29 = vadd.f32 %v1573_v27, %v1569_v25 }
0x124c   :  { %2702 = vtanh.f32 %v1575_v29  ;;  %v1691_v3 = vrot.slane %v1575_v29, 6  ;;  %v1711_v29 = vld [vmem:[#allocation2 + $0x8] sm:$0xc] }
0x1259   :  { %v2703_v33 = vpop.eup %2702 }
0x125a   :  { %v1577_v41 = vmul.f32 %v2703_v33, %v2701_v30  ;;  %v1715_v33 = vrot.slane %v1711_v29, 6 }
0x125c   :  { %1579 = vrot.lane.b32.xlu0 %v1577_v41, %s2789_s8 }
0x12ce   :  { %v1580_v42 = vpop.permute.xlu0 %1579 }
0x12cf   :  { %1582 = vst.msk [vmem:[#allocation4] sm:$0x3] %vm450_vm4, %v1580_v42  ;;  %2520 = vmatmul.mubr.msk.f32.vlgmr.msra.gmra.mxu1 %vm123_vm1, %v1580_v42 }
0x12d0   :  { %1583 = vst.msk [vmem:[#allocation4 + $0xe] sm:$0x3] %vm452_vm5, %v1580_v42  ;;  %1869 = vmatpush1.msra.mxu1 %v3271_v31  ;;  %1916 = vmatprep.mubr.f32.mxu1 %v2788_v28  ;;  %v1709_v42 = vld [vmem:[#allocation2] sm:$0x30] }
0x12d1   :  { %1870 = vmatprep.subr.mxu1 %v3276_v32  ;;  %v1719_v52 = vsel %vm3033_vm3, %v1709_v42, %v1715_v33 }
0x12d2   :  { %1871 = vmatpush1.msra.mxu1 %v3281_v34 }
0x12d3   :  { %1872 = vmatprep.subr.mxu1 %v3287_v35 }
0x12d4   :  { %1873 = vmatpush1.msra.mxu1 %v3296_v43 }
0x12d5   :  { %1874 = vmatprep.subr.mxu1 %v3301_v44 }
0x12d6   :  { %1875 = vmatpush1.msra.mxu1 %v3306_v45 }
0x12d7   :  { %1876 = vmatprep.subr.mxu1 %v3313_v46 }
0x12d8   :  { %1877 = vmatpush1.msra.mxu1 %v3319_v47 }
0x12d9   :  { %1878 = vmatprep.subr.mxu1 %v3325_v24 }
0x12da   :  { %1879 = vmatpush1.msra.mxu1 %v3331_v61 }
0x12db   :  { %1880 = vmatprep.subr.mxu1 %v3337_v48 }
0x12dc   :  { %1881 = vmatpush1.msra.mxu1 %v3343_v49 }
0x12dd   :  { %1882 = vmatprep.subr.mxu1 %v3349_v50 }
0x12de   :  { %1883 = vmatpush1.msra.mxu1 %v3355_v51 }
0x12df   :  { %2113 = vmatprep.subr.mxu1 %v3254_v26 }
0x138f   :  { %v1664_v37 = vpop.f32.mrf.mxu1 }
0x1390   :  { %v1671_v39 = vrot.slane %v1664_v37, 6 }
0x1391   :  { %v1666_v56 = vpop.f32.mrf.mxu1 }
0x1392   :  { %v1675_v40 = vadd.f32 %v1671_v39, %v1594_v36  ;;  %v1672_v58 = vrot.slane %v1666_v56, 6 }
0x1394   :  { %v2521_v54 = vmul.f32 -1.442695, %v1675_v40  ;;  %v1676_v62 = vadd.f32 %v1672_v58, %v1595_v60 }
0x1396   :  { %2704 = vpow2.f32 %v2521_v54  ;;  %v2522_v7 = vmul.f32 -1.442695, %v1676_v62 }
0x1397   :  { %2706 = vtanh.f32 %v1676_v62 }
0x13a3   :  { %v2705_v63 = vpop.eup %2704 }
0x13a4   :  { %v1683_v0 = vadd.f32 1.0, %v2705_v63  ;;  %v2707_v2 = vpop.eup %2706 }
0x13a6   :  { %2708 = vrcp.f32 %v1683_v0 }
0x13a7   :  { %2710 = vpow2.f32 %v2522_v7  ;;  %v1835_v7 = vld [vmem:[#allocation2 + $0x10] sm:$0xc0] }
0x13b3   :  { %v2709_v4 = vpop.eup %2708 }
0x13b4   :  { %v1694_v5 = vmul.f32 %v2709_v4, %v2707_v2  ;;  %v1693_v6 = vmul.f32 %v2709_v4, %v1691_v3  ;;  %v2711_v11 = vpop.eup %2710  ;;  %v1837_v4 = vld [vmem:[#allocation2 + $0x18] sm:$0x3] }
0x13b5   :  { %v1684_v8 = vadd.f32 1.0, %v2711_v11 }
0x13b6   :  { %1696 = vrot.lane.b32.xlu1 %v1694_v5, %s2789_s8  ;;  %v1841_v5 = vrot.slane %v1837_v4, 2 }
0x13b7   :  { %2712 = vrcp.f32 %v1684_v8 }
0x13b8   :  { %v1845_v8 = vsel %vm3027_vm2, %v1835_v7, %v1841_v5 }
0x13c4   :  { %v2713_v13 = vpop.eup %2712 }
0x1428   :  { %v1697_v10 = vpop.permute.xlu1 %1696 }
0x1429   :  { %v1699_v12 = vadd.f32 %v1697_v10, %v1693_v6 }
0x142b   :  { %2714 = vtanh.f32 %v1699_v12  ;;  %v1818_v36 = vrot.slane %v1699_v12, 6 }
0x1438   :  { %v2715_v1 = vpop.eup %2714 }
0x1439   :  { %v3436_v14 = vmul.f32 %v2715_v1, %v2713_v13  ;;  %v1838_v13 = vld [vmem:[#allocation2 + $0x8] sm:$0x3] }
0x143b   :  { %v1720_v15 = vrot.slane %v3436_v14, 2 }
0x143d   :  { %1721 = vrot.lane.b32.xlu0 %v1720_v15, %s2789_s8  ;;  %v1842_v15 = vrot.slane %v1838_v13, 2 }
0x143f   :  { %v1846_v18 = vsel %vm3033_vm3, %v1836_v17, %v1842_v15 }
0x14af   :  { %v1722_v16 = vpop.permute.xlu0 %1721 }
0x14b0   :  { %2523 = vmatmul.mubr.msk.f32.vlgmr.msra.gmra.mxu0 %vm123_vm1, %v1722_v16 }
0x14b1   :  { %1996 = vmatpush1.msra.mxu0 %v3271_v31  ;;  %2043 = vmatprep.mubr.f32.mxu0 %v2788_v28 }
0x14b2   :  { %1997 = vmatprep.subr.mxu0 %v3276_v32 }
0x14b3   :  { %1998 = vmatpush1.msra.mxu0 %v3281_v34 }
0x14b4   :  { %1999 = vmatprep.subr.mxu0 %v3287_v35 }
0x14b5   :  { %2000 = vmatpush1.msra.mxu0 %v3296_v43 }
0x14b6   :  { %2001 = vmatprep.subr.mxu0 %v3301_v44 }
0x14b7   :  { %2002 = vmatpush1.msra.mxu0 %v3306_v45 }
0x14b8   :  { %2003 = vmatprep.subr.mxu0 %v3313_v46 }
0x14b9   :  { %2004 = vmatpush1.msra.mxu0 %v3319_v47 }
0x14ba   :  { %2005 = vmatprep.subr.mxu0 %v3325_v24 }
0x14bb   :  { %2006 = vmatpush1.msra.mxu0 %v3331_v61 }
0x14bc   :  { %2007 = vmatprep.subr.mxu0 %v3337_v48 }
0x14bd   :  { %2008 = vmatpush1.msra.mxu0 %v3343_v49 }
0x14be   :  { %2009 = vmatprep.subr.mxu0 %v3349_v50 }
0x14bf   :  { %2010 = vmatpush1.msra.mxu0 %v3355_v51 }
0x14c0   :  { %2240 = vmatprep.subr.mxu0 %v3254_v26 }
0x1570   :  { %v1791_v20 = vpop.f32.mrf.mxu0 }
0x1571   :  { %v1798_v22 = vrot.slane %v1791_v20, 4 }
0x1572   :  { %v1793_v30 = vpop.f32.mrf.mxu0 }
0x1573   :  { %v1802_v25 = vadd.f32 %v1798_v22, %v1718_v23  ;;  %v1799_v41 = vrot.slane %v1793_v30, 4 }
0x1575   :  { %v2524_v27 = vmul.f32 -1.442695, %v1802_v25  ;;  %v1803_v53 = vadd.f32 %v1799_v41, %v1719_v52 }
0x1577   :  { %2716 = vpow2.f32 %v2524_v27  ;;  %v2525_v56 = vmul.f32 -1.442695, %v1803_v53 }
0x1578   :  { %2718 = vtanh.f32 %v1803_v53 }
0x1584   :  { %v2717_v37 = vpop.eup %2716 }
0x1585   :  { %v1810_v38 = vadd.f32 1.0, %v2717_v37  ;;  %v2719_v39 = vpop.eup %2718 }
0x1587   :  { %2720 = vrcp.f32 %v1810_v38 }
0x1588   :  { %2722 = vpow2.f32 %v2525_v56 }
0x1594   :  { %v2721_v40 = vpop.eup %2720 }
0x1595   :  { %v1821_v54 = vmul.f32 %v2721_v40, %v2719_v39  ;;  %v1820_v55 = vmul.f32 %v2721_v40, %v1818_v36  ;;  %v2723_v57 = vpop.eup %2722  ;;  %v1964_v40 = vld [vmem:[#allocation2 + $0x10] sm:$0xc0] }
0x1596   :  { %v1811_v58 = vadd.f32 1.0, %v2723_v57 }
0x1597   :  { %1823 = vrot.lane.b32.xlu1 %v1821_v54, %s2789_s8  ;;  %v1962_v54 = vld [vmem:[#allocation2 + $0x18] sm:$0x3] }
0x1598   :  { %2724 = vrcp.f32 %v1811_v58 }
0x15a5   :  { %v2725_v62 = vpop.eup %2724 }
0x1609   :  { %v1824_v59 = vpop.permute.xlu1 %1823 }
0x160a   :  { %v1826_v60 = vadd.f32 %v1824_v59, %v1820_v55  ;;  %v1968_v55 = vrot.slane %v1964_v40, 6 }
0x160c   :  { %2726 = vtanh.f32 %v1826_v60  ;;  %v1945_v23 = vrot.slane %v1826_v60, 6  ;;  %v1972_v56 = vsel %vm3027_vm2, %v1962_v54, %v1968_v55  ;;  %v1965_v60 = vld [vmem:[#allocation2] sm:$0xc0]  ;;  %v2209_v55 = vld [vmem:[#allocation2 + $0x10] sm:$0xc] }
0x1619   :  { %v2727_v63 = vpop.eup %2726 }
0x161a   :  { %v3463_v0 = vmul.f32 %v2727_v63, %v2725_v62  ;;  %v1963_v62 = vld [vmem:[#allocation2 + $0x8] sm:$0x3]  ;;  %v1969_v63 = vrot.slane %v1965_v60, 6 }
0x161c   :  { %v1847_v2 = vrot.slane %v3463_v0, 4 }
0x161e   :  { %1848 = vrot.lane.b32.xlu0 %v1847_v2, %s2789_s8 }
0x1690   :  { %v1849_v3 = vpop.permute.xlu0 %1848 }
0x1691   :  { %2526 = vmatmul.mubr.msk.f32.vlgmr.msra.gmra.mxu1 %vm123_vm1, %v1849_v3  ;;  %v1973_v3 = vsel %vm3033_vm3, %v1963_v62, %v1969_v63 }
0x1692   :  { %2114 = vmatpush1.msra.mxu1 %v3271_v31  ;;  %2161 = vmatprep.mubr.f32.mxu1 %v2788_v28 }
0x1693   :  { %2115 = vmatprep.subr.mxu1 %v3276_v32 }
0x1694   :  { %2116 = vmatpush1.msra.mxu1 %v3281_v34 }
0x1695   :  { %2117 = vmatprep.subr.mxu1 %v3287_v35 }
0x1696   :  { %2118 = vmatpush1.msra.mxu1 %v3296_v43 }
0x1697   :  { %2119 = vmatprep.subr.mxu1 %v3301_v44 }
0x1698   :  { %2120 = vmatpush1.msra.mxu1 %v3306_v45 }
0x1699   :  { %2121 = vmatprep.subr.mxu1 %v3313_v46 }
0x169a   :  { %2122 = vmatpush1.msra.mxu1 %v3319_v47 }
0x169b   :  { %2123 = vmatprep.subr.mxu1 %v3325_v24 }
0x169c   :  { %2124 = vmatpush1.msra.mxu1 %v3331_v61 }
0x169d   :  { %2125 = vmatprep.subr.mxu1 %v3337_v48 }
0x169e   :  { %2126 = vmatpush1.msra.mxu1 %v3343_v49 }
0x169f   :  { %2127 = vmatprep.subr.mxu1 %v3349_v50 }
0x16a0   :  { %2128 = vmatpush1.msra.mxu1 %v3355_v51 }
0x16a1   :  { %2367 = vmatprep.subr.mxu1 %v3254_v26 }
0x1751   :  { %v1918_v6 = vpop.f32.mrf.mxu1 }
0x1752   :  { %v1925_v11 = vrot.slane %v1918_v6, 2 }
0x1753   :  { %v1920_v1 = vpop.f32.mrf.mxu1 }
0x1754   :  { %v1929_v10 = vadd.f32 %v1925_v11, %v1845_v8  ;;  %v1926_v16 = vrot.slane %v1920_v1, 2 }
0x1756   :  { %v2527_v12 = vmul.f32 -1.442695, %v1929_v10  ;;  %v1930_v26 = vadd.f32 %v1926_v16, %v1846_v18 }
0x1758   :  { %2728 = vpow2.f32 %v2527_v12  ;;  %v2528_v30 = vmul.f32 -1.442695, %v1930_v26 }
0x1759   :  { %2730 = vtanh.f32 %v1930_v26 }
0x1765   :  { %v2729_v20 = vpop.eup %2728 }
0x1766   :  { %v1937_v21 = vadd.f32 1.0, %v2729_v20  ;;  %v2731_v22 = vpop.eup %2730 }
0x1768   :  { %2732 = vrcp.f32 %v1937_v21 }
0x1769   :  { %2734 = vpow2.f32 %v2528_v30 }
0x1775   :  { %v2733_v25 = vpop.eup %2732 }
0x1776   :  { %v1948_v27 = vmul.f32 %v2733_v25, %v2731_v22  ;;  %v1947_v29 = vmul.f32 %v2733_v25, %v1945_v23  ;;  %v2735_v33 = vpop.eup %2734 }
0x1777   :  { %v1938_v41 = vadd.f32 1.0, %v2735_v33 }
0x1778   :  { %1950 = vrot.lane.b32.xlu1 %v1948_v27, %s2789_s8 }
0x1779   :  { %2736 = vrcp.f32 %v1938_v41 }
0x1786   :  { %v2737_v53 = vpop.eup %2736 }
0x17ea   :  { %v1951_v42 = vpop.permute.xlu1 %1950 }
0x17eb   :  { %v1953_v52 = vadd.f32 %v1951_v42, %v1947_v29 }
0x17ed   :  { %2738 = vtanh.f32 %v1953_v52  ;;  %v2066_v11 = vrot.slane %v1953_v52, 6 }
0x17fa   :  { %v2739_v37 = vpop.eup %2738 }
0x17fb   :  { %v3490_v38 = vmul.f32 %v2739_v37, %v2737_v53 }
0x17fd   :  { %v1974_v39 = vrot.slane %v3490_v38, 6 }
0x17ff   :  { %1975 = vrot.lane.b32.xlu0 %v1974_v39, %s2789_s8 }
0x1871   :  { %v1976_v36 = vpop.permute.xlu0 %1975 }
0x1872   :  { %2529 = vmatmul.mubr.msk.f32.vlgmr.msra.gmra.mxu0 %vm123_vm1, %v1976_v36 }
0x1873   :  { %2241 = vmatpush1.msra.mxu0 %v3271_v31  ;;  %2288 = vmatprep.mubr.f32.mxu0 %v2788_v28 }
0x1874   :  { %2242 = vmatprep.subr.mxu0 %v3276_v32 }
0x1875   :  { %2243 = vmatpush1.msra.mxu0 %v3281_v34 }
0x1876   :  { %2244 = vmatprep.subr.mxu0 %v3287_v35 }
0x1877   :  { %2245 = vmatpush1.msra.mxu0 %v3296_v43 }
0x1878   :  { %2246 = vmatprep.subr.mxu0 %v3301_v44 }
0x1879   :  { %2247 = vmatpush1.msra.mxu0 %v3306_v45 }
0x187a   :  { %2248 = vmatprep.subr.mxu0 %v3313_v46 }
0x187b   :  { %2249 = vmatpush1.msra.mxu0 %v3319_v47 }
0x187c   :  { %2250 = vmatprep.subr.mxu0 %v3325_v24 }
0x187d   :  { %2251 = vmatpush1.msra.mxu0 %v3331_v61 }
0x187e   :  { %2252 = vmatprep.subr.mxu0 %v3337_v48 }
0x187f   :  { %2253 = vmatpush1.msra.mxu0 %v3343_v49 }
0x1880   :  { %2254 = vmatprep.subr.mxu0 %v3349_v50 }
0x1881   :  { %2255 = vmatpush1.msra.mxu0 %v3355_v51 }
0x1932   :  { %v2045_v57 = vpop.f32.mrf.mxu0 }
0x1933   :  { %v2050_v58 = vadd.f32 %v2045_v57, %v1972_v56  ;;  %v2207_v56 = vld [vmem:[#allocation2 + $0x18] sm:$0x30]  ;;  %v2213_v57 = vrot.slane %v2209_v55, 6 }
0x1934   :  { %v2047_v2 = vpop.f32.mrf.mxu0 }
0x1935   :  { %v2530_v59 = vmul.f32 -1.442695, %v2050_v58  ;;  %v2051_v4 = vadd.f32 %v2047_v2, %v1973_v3  ;;  %v2217_v60 = vsel %vm3027_vm2, %v2207_v56, %v2213_v57  ;;  %v2210_v3 = vld [vmem:[#allocation2] sm:$0xc] }
0x1937   :  { %2740 = vpow2.f32 %v2530_v59  ;;  %v2531_v13 = vmul.f32 -1.442695, %v2051_v4 }
0x1938   :  { %2742 = vtanh.f32 %v2051_v4  ;;  %v2208_v4 = vld [vmem:[#allocation2 + $0x8] sm:$0x30] }
0x1944   :  { %v2741_v5 = vpop.eup %2740 }
0x1945   :  { %v2058_v6 = vadd.f32 1.0, %v2741_v5  ;;  %v2743_v7 = vpop.eup %2742 }
0x1947   :  { %2744 = vrcp.f32 %v2058_v6  ;;  %v2214_v6 = vrot.slane %v2210_v3, 6 }
0x1948   :  { %2746 = vpow2.f32 %v2531_v13 }
0x1954   :  { %v2745_v8 = vpop.eup %2744 }
0x1955   :  { %v2069_v10 = vmul.f32 %v2745_v8, %v2743_v7  ;;  %v2068_v12 = vmul.f32 %v2745_v8, %v2066_v11  ;;  %v2747_v1 = vpop.eup %2746  ;;  %v2218_v7 = vsel %vm3033_vm3, %v2208_v4, %v2214_v6 }
0x1956   :  { %v2059_v15 = vadd.f32 1.0, %v2747_v1 }
0x1957   :  { %2071 = vrot.lane.b32.xlu1 %v2069_v10, %s2789_s8 }
0x1958   :  { %2748 = vrcp.f32 %v2059_v15 }
0x1965   :  { %v2749_v18 = vpop.eup %2748 }
0x19c9   :  { %v2072_v16 = vpop.permute.xlu1 %2071 }
0x19ca   :  { %v2074_v17 = vadd.f32 %v2072_v16, %v2068_v12 }
0x19cc   :  { %2750 = vtanh.f32 %v2074_v17  ;;  %v2190_v25 = vrot.slane %v2074_v17, 6 }
0x19d9   :  { %v2751_v26 = vpop.eup %2750 }
0x19da   :  { %v2076_v20 = vmul.f32 %v2751_v26, %v2749_v18 }
0x19dc   :  { %2078 = vrot.lane.b32.xlu0 %v2076_v20, %s2789_s8 }
0x1a4e   :  { %v3517_v21 = vpop.permute.xlu0 %2078 }
0x1a4f   :  { %2532 = vmatmul.mubr.msk.f32.vlgmr.msra.gmra.mxu1 %vm123_vm1, %v3517_v21 }
0x1a50   :  { %2368 = vmatpush1.msra.mxu1 %v3271_v31  ;;  %2415 = vmatprep.mubr.f32.mxu1 %v2788_v28  ;;  %v2085_v28 = vld [vmem:[#allocation2 + $0x10] sm:$0x30]  ;;  %v2083_v31 = vld [vmem:[#allocation2 + $0x18] sm:$0xc] }
0x1a51   :  { %2369 = vmatprep.subr.mxu1 %v3276_v32  ;;  %v2089_v32 = vrot.slane %v2085_v28, 2 }
0x1a52   :  { %2370 = vmatpush1.msra.mxu1 %v3281_v34 }
0x1a53   :  { %2371 = vmatprep.subr.mxu1 %v3287_v35 }
0x1a54   :  { %2372 = vmatpush1.msra.mxu1 %v3296_v43  ;;  %v2093_v43 = vsel %vm3027_vm2, %v2083_v31, %v2089_v32 }
0x1a55   :  { %2373 = vmatprep.subr.mxu1 %v3301_v44 }
0x1a56   :  { %2374 = vmatpush1.msra.mxu1 %v3306_v45 }
0x1a57   :  { %2375 = vmatprep.subr.mxu1 %v3313_v46 }
0x1a58   :  { %2376 = vmatpush1.msra.mxu1 %v3319_v47  ;;  %v2086_v47 = vld [vmem:[#allocation2] sm:$0x30] }
0x1a59   :  { %2377 = vmatprep.subr.mxu1 %v3325_v24  ;;  %v2084_v24 = vld [vmem:[#allocation2 + $0x8] sm:$0xc] }
0x1a5a   :  { %2378 = vmatpush1.msra.mxu1 %v3331_v61 }
0x1a5b   :  { %2379 = vmatprep.subr.mxu1 %v3337_v48  ;;  %v2090_v48 = vrot.slane %v2086_v47, 2 }
0x1a5c   :  { %2380 = vmatpush1.msra.mxu1 %v3343_v49 }
0x1a5d   :  { %2381 = vmatprep.subr.mxu1 %v3349_v50  ;;  %v2094_v49 = vsel %vm3033_vm3, %v2084_v24, %v2090_v48 }
0x1a5e   :  { %2382 = vmatpush1.msra.mxu1 %v3355_v51 }
0x1b0f   :  { %v2163_v34 = vpop.f32.mrf.mxu1 }
0x1b10   :  { %v2170_v35 = vrot.slane %v2163_v34, 6 }
0x1b11   :  { %v2165_v46 = vpop.f32.mrf.mxu1 }
0x1b12   :  { %v2174_v44 = vadd.f32 %v2170_v35, %v2093_v43  ;;  %v2171_v61 = vrot.slane %v2165_v46, 6  ;;  %v2334_v46 = vld [vmem:[#allocation2 + $0x18] sm:$0xc0] }
0x1b14   :  { %v2533_v45 = vmul.f32 -1.442695, %v2174_v44  ;;  %v2175_v50 = vadd.f32 %v2171_v61, %v2094_v49 }
0x1b16   :  { %2752 = vpow2.f32 %v2533_v45  ;;  %v2534_v33 = vmul.f32 -1.442695, %v2175_v50 }
0x1b17   :  { %2754 = vtanh.f32 %v2175_v50 }
0x1b23   :  { %v2753_v51 = vpop.eup %2752 }
0x1b24   :  { %v2182_v22 = vadd.f32 1.0, %v2753_v51  ;;  %v2755_v23 = vpop.eup %2754 }
0x1b26   :  { %2756 = vrcp.f32 %v2182_v22  ;;  %v2337_v22 = vld [vmem:[#allocation2] sm:$0x3] }
0x1b27   :  { %2758 = vpow2.f32 %v2534_v33 }
0x1b33   :  { %v2757_v27 = vpop.eup %2756 }
0x1b34   :  { %v2193_v29 = vmul.f32 %v2757_v27, %v2755_v23  ;;  %v2192_v30 = vmul.f32 %v2757_v27, %v2190_v25  ;;  %v2759_v41 = vpop.eup %2758  ;;  %v2335_v23 = vld [vmem:[#allocation2 + $0x8] sm:$0xc0]  ;;  %v2341_v25 = vrot.slane %v2337_v22, 2 }
0x1b35   :  { %v2183_v42 = vadd.f32 1.0, %v2759_v41 }
0x1b36   :  { %2195 = vrot.lane.b32.xlu1 %v2193_v29, %s2789_s8  ;;  %v2345_v27 = vsel %vm3033_vm3, %v2335_v23, %v2341_v25 }
0x1b37   :  { %2760 = vrcp.f32 %v2183_v42 }
0x1b44   :  { %v2761_v37 = vpop.eup %2760 }
0x1ba8   :  { %v2196_v52 = vpop.permute.xlu1 %2195 }
0x1ba9   :  { %v2198_v53 = vadd.f32 %v2196_v52, %v2192_v30 }
0x1bab   :  { %2762 = vtanh.f32 %v2198_v53  ;;  %v2317_v13 = vrot.slane %v2198_v53, 6 }
0x1bb8   :  { %v2763_v39 = vpop.eup %2762 }
0x1bb9   :  { %v3542_v36 = vmul.f32 %v2763_v39, %v2761_v37 }
0x1bbb   :  { %v2219_v40 = vrot.slane %v3542_v36, 2 }
0x1bbd   :  { %2220 = vrot.lane.b32.xlu0 %v2219_v40, %s2789_s8 }
0x1c2f   :  { %v2221_v54 = vpop.permute.xlu0 %2220 }
0x1c30   :  { %2535 = vmatmul.mubr.msk.f32.vlgmr.msra.gmra.mxu0 %vm123_vm1, %v2221_v54 }
0x1cf0   :  { %v2290_v58 = vpop.f32.mrf.mxu0 }
0x1cf1   :  { %v2297_v59 = vrot.slane %v2290_v58, 4 }
0x1cf2   :  { %v2292_v2 = vpop.f32.mrf.mxu0 }
0x1cf3   :  { %v2301_v62 = vadd.f32 %v2297_v59, %v2217_v60  ;;  %v2298_v5 = vrot.slane %v2292_v2, 4  ;;  %v2461_v59 = vld [vmem:[%s3599_s1 + $0x292] ss:$0 sm:$0xff] }
0x1cf5   :  { %v2536_v63 = vmul.f32 -1.442695, %v2301_v62  ;;  %v2302_v11 = vadd.f32 %v2298_v5, %v2218_v7  ;;  %v2472_v5 = vld [vmem:[%s3599_s1 + $0x291] ss:$0 sm:$0xff] }
0x1cf7   :  { %2764 = vpow2.f32 %v2536_v63  ;;  %v2537_v17 = vmul.f32 -1.442695, %v2302_v11 }
0x1cf8   :  { %2766 = vtanh.f32 %v2302_v11 }
0x1d04   :  { %v2765_v8 = vpop.eup %2764 }
0x1d05   :  { %v2309_v10 = vadd.f32 1.0, %v2765_v8  ;;  %v2767_v12 = vpop.eup %2766 }
0x1d07   :  { %2768 = vrcp.f32 %v2309_v10 }
0x1d08   :  { %2770 = vpow2.f32 %v2537_v17 }
0x1d14   :  { %v2769_v1 = vpop.eup %2768 }
0x1d15   :  { %v2320_v15 = vmul.f32 %v2769_v1, %v2767_v12  ;;  %v2319_v16 = vmul.f32 %v2769_v1, %v2317_v13  ;;  %v2771_v18 = vpop.eup %2770 }
0x1d16   :  { %v2310_v26 = vadd.f32 1.0, %v2771_v18 }
0x1d17   :  { %2322 = vrot.lane.b32.xlu1 %v2320_v15, %s2789_s8 }
0x1d18   :  { %2772 = vrcp.f32 %v2310_v26 }
0x1d25   :  { %v2773_v31 = vpop.eup %2772 }
0x1d89   :  { %v2323_v20 = vpop.permute.xlu1 %2322 }
0x1d8a   :  { %v2325_v28 = vadd.f32 %v2323_v20, %v2319_v16 }
0x1d8c   :  { %2774 = vtanh.f32 %v2325_v28  ;;  %v2444_v42 = vrot.slane %v2325_v28, 6 }
0x1d99   :  { %v2775_v32 = vpop.eup %2774 }
0x1d9a   :  { %v2327_v34 = vmul.f32 %v2775_v32, %v2773_v31 }
0x1d9c   :  { %v2346_v35 = vrot.slane %v2327_v34, 4 }
0x1d9e   :  { %2347 = vrot.lane.b32.xlu0 %v2346_v35, %s2789_s8 }
0x1da2   :  { %1703 = vrot.lane.b32.xlu0 %v3436_v14, %s2789_s8 }
0x1da6   :  { %1957 = vrot.lane.b32.xlu0 %v3490_v38, %s2789_s8  ;;  %v2336_v38 = vld [vmem:[#allocation2 + $0x10] sm:$0x3] }
0x1da7   :  { %v2340_v47 = vrot.slane %v2336_v38, 2 }
0x1da9   :  { %v2344_v48 = vsel %vm3027_vm2, %v2334_v46, %v2340_v47 }
0x1daa   :  { %2329 = vrot.lane.b32.xlu0 %v2327_v34, %s2789_s8 }
0x1e10   :  { %v2348_v43 = vpop.permute.xlu0 %2347 }
0x1e11   :  { %2538 = vmatmul.mubr.msk.f32.vlgmr.msra.gmra.mxu1 %vm123_vm1, %v2348_v43 }
0x1e14   :  { %v1704_v44 = vpop.permute.xlu0 %1703 }
0x1e15   :  { %1706 = vst.msk [vmem:[#allocation4] sm:$0xc] %vm576_vm6, %v1704_v44 }
0x1e16   :  { %1707 = vst.msk [vmem:[#allocation4 + $0xa] sm:$0xc] %vm578_vm7, %v1704_v44 }
0x1e18   :  { %v1958_v45 = vpop.permute.xlu0 %1957 }
0x1e19   :  { %1960 = vst.msk [vmem:[#allocation4] sm:$0xc0] %vm834_vm8, %v1958_v45 }
0x1e1a   :  { %1961 = vst.msk [vmem:[#allocation4 + $0x2] sm:$0xc0] %vm836_vm9, %v1958_v45 }
0x1e1b   :  { %2081 = vst.msk [vmem:[#allocation4 + $0x8] sm:$0x3] %vm450_vm4, %v3517_v21 }
0x1e1c   :  { %2082 = vst.msk [vmem:[#allocation4 + $0x6] sm:$0x3] %vm452_vm5, %v3517_v21  ;;  %v2330_v14 = vpop.permute.xlu0 %2329 }
0x1e1d   :  { %2332 = vst.msk [vmem:[#allocation4 + $0x8] sm:$0x30] %vm705_vm10, %v2330_v14 }
0x1e1e   :  { %2333 = vst.msk [vmem:[#allocation4 - $0x2] sm:$0x30] %vm707_vm11, %v2330_v14 }
0x1ed1   :  { %v2417_v24 = vpop.f32.mrf.mxu1 }
0x1ed2   :  { %v2424_v61 = vrot.slane %v2417_v24, 2 }
0x1ed3   :  { %v2419_v51 = vpop.f32.mrf.mxu1 }
0x1ed4   :  { %v2428_v49 = vadd.f32 %v2424_v61, %v2344_v48  ;;  %v2425_v21 = vrot.slane %v2419_v51, 2 }
0x1ed6   :  { %v2539_v50 = vmul.f32 -1.442695, %v2428_v49  ;;  %v2429_v29 = vadd.f32 %v2425_v21, %v2345_v27 }
0x1ed8   :  { %2776 = vpow2.f32 %v2539_v50  ;;  %v2540_v19 = vmul.f32 -1.442695, %v2429_v29 }
0x1ed9   :  { %2778 = vtanh.f32 %v2429_v29 }
0x1ee5   :  { %v2777_v30 = vpop.eup %2776 }
0x1ee6   :  { %v2436_v33 = vadd.f32 1.0, %v2777_v30  ;;  %v2779_v41 = vpop.eup %2778 }
0x1ee8   :  { %2780 = vrcp.f32 %v2436_v33 }
0x1ee9   :  { %2782 = vpow2.f32 %v2540_v19 }
0x1ef5   :  { %v2781_v9 = vpop.eup %2780 }
0x1ef6   :  { %v2447_v52 = vmul.f32 %v2781_v9, %v2779_v41  ;;  %v2446_v53 = vmul.f32 %v2781_v9, %v2444_v42  ;;  %v2783_v37 = vpop.eup %2782 }
0x1ef7   :  { %v2437_v39 = vadd.f32 1.0, %v2783_v37 }
0x1ef8   :  { %2449 = vrot.lane.b32.xlu1 %v2447_v52, %s2789_s8 }
0x1ef9   :  { %2784 = vrcp.f32 %v2437_v39 }
0x1efc   :  { %1830 = vrot.lane.b32.xlu1 %v3463_v0, %s2789_s8 }
0x1f00   :  { %2202 = vrot.lane.b32.xlu1 %v3542_v36, %s2789_s8 }
0x1f06   :  { %v2785_v0 = vpop.eup %2784 }
0x1f6a   :  { %v2450_v40 = vpop.permute.xlu1 %2449 }
0x1f6b   :  { %v2452_v54 = vadd.f32 %v2450_v40, %v2446_v53 }
0x1f6d   :  { %2786 = vtanh.f32 %v2452_v54 }
0x1f6e   :  { %v1831_v55 = vpop.permute.xlu1 %1830 }
0x1f6f   :  { %1833 = vst.msk [vmem:[#allocation4] sm:$0x30] %vm705_vm10, %v1831_v55 }
0x1f70   :  { %1834 = vst.msk [vmem:[#allocation4 + $0x6] sm:$0x30] %vm707_vm11, %v1831_v55 }
0x1f72   :  { %v2203_v56 = vpop.permute.xlu1 %2202 }
0x1f73   :  { %2205 = vst.msk [vmem:[#allocation4 + $0x8] sm:$0xc] %vm576_vm6, %v2203_v56 }
0x1f74   :  { %2206 = vst.msk [vmem:[#allocation4 + $0x2] sm:$0xc] %vm578_vm7, %v2203_v56 }
0x1f7a   :  { %v2787_v36 = vpop.eup %2786 }
0x1f7b   :  { %v2454_v57 = vmul.f32 %v2787_v36, %v2785_v0 }
0x1f7d   :  { %2456 = vrot.lane.b32.xlu1 %v2454_v57, %s2789_s8 }
0x1fef   :  { %v2457_v58 = vpop.permute.xlu1 %2456 }
0x1ff0   :  { %2459 = vst.msk [vmem:[#allocation4 + $0x8] sm:$0xc0] %vm834_vm8, %v2457_v58 }
0x1ff1   :  { %2460 = vst.msk [vmem:[#allocation4 - $0x6] sm:$0xc0] %vm836_vm9, %v2457_v58 }
0x1ff7   :  { %v2463_v60 = vld [vmem:[#allocation4 + $0x8] sm:$0xff] }
0x1ff8   :  { %v2462_v62 = vld [vmem:[#allocation4] sm:$0xff]  ;;  %v2465_v63 = vmul.f32 %v2463_v60, %v2461_v59 }
0x1ff9   :  { %v2464_v2 = vmul.f32 %v2462_v62, %v2461_v59 }
0x1ffa   :  { %v2469_v3 = vsel %vm123_vm1, %v2465_v63, 0.0 }
0x1ffb   :  { %v2466_v4 = vsel %vm123_vm1, %v2464_v2, 0.0  ;;  %2470 = vadd.xlane.f32.xlu1 %v2469_v3 }
0x1ffc   :  { %2467 = vadd.xlane.f32.xlu0 %v2466_v4 }
0x2084   :  { %v2471_v6 = vpop.xlane.xlu1 %2470 }
0x2085   :  { %v2468_v7 = vpop.xlane.xlu0 %2467  ;;  %v2474_v11 = vadd.f32 %v2472_v5, %v2471_v6 }
0x2086   :  { %v2473_v8 = vadd.f32 %v2472_v5, %v2468_v7 }
0x2087   :  { %2477 = vst.msk [vmem:[%s3601_s2 + $0x8] sm:$0xff] %vm2475_vm12, %v2474_v11 }
0x2088   :  { %2476 = vst.msk [vmem:[%s3601_s2] sm:$0xff] %vm2475_vm12, %v2473_v8 }

</bundles_post_ra>
